<compile_context>
chip_gen: v7x
topology: tpu7x:2x2x1
jax: 0.10.0
libtpu: 0.0.40
codegen_flags: <defaults>
</compile_context>

<pallas_src>
import functools

import jax
import jax.numpy as jnp
from jax.experimental import pallas as pl
from jax.experimental.pallas import tpu as pltpu

C_HID = 1280      # c_ : conv output channels
LANE = 128
SUBLANE = 8


def _round_up(x, m):
    return (x + m - 1) // m * m


# --------------- fused conv(1x1)+BN+SiLU + adaptive-avg-pool kernel ------------
def _conv_pool_kernel(x_ref, w_ref, b_ref, o_ref, *, inv_l, pad_l):
    """One (B_blk, tile_L) tile of: mean_L silu(x @ W + b).

    x_ref: (B_blk, tile_L, C1_pad)  bf16/f32
    w_ref: (C1_pad, C_HID)          bf16/f32  (BN folded into W)
    b_ref: (1, C_HID)               f32       (BN folded bias)
    o_ref: (B_blk, C_HID)           f32       (VMEM-resident accumulator)
    """
    li = pl.program_id(1)

    @pl.when(li == 0)
    def _init():
        o_ref[...] = jnp.zeros_like(o_ref)

    bb, lt, c1p = x_ref.shape
    x2 = x_ref[...].reshape(bb * lt, c1p)                       # sublane merge, aligned
    z = jnp.dot(x2, w_ref[...], preferred_element_type=jnp.float32)   # MXU, f32 acc
    z = z + b_ref[...]
    # SiLU kept in f32: v5e has no bf16 VPU/EUP, and f32 makes the padded-row
    # correction at finalize cancel exactly.
    z = z * jax.nn.sigmoid(z)
    o_ref[...] += jnp.sum(z.reshape(bb, lt, C_HID), axis=1)     # sum over this L tile

    @pl.when(li == pl.num_programs(1) - 1)
    def _finalize():
        b = b_ref[...]
        pad_term = (b * jax.nn.sigmoid(b)) * pad_l              # zero-padded rows -> silu(b)
        o_ref[...] = (o_ref[...] - pad_term) * inv_l


# ----------------------------------- wrapper -----------------------------------
def classify_v22_forward(x, params, *, tile_l=128, block_b=8, use_bf16=True):
    """ClassifyV22 eval-mode forward.

    x: (B, C1, L) float32 in PyTorch NCL layout, or a list of such arrays
       (concatenated on the channel axis, matching the PyTorch forward).
    Returns the pooled feature, shape (B, 1280) float32.
    """
    if isinstance(x, (list, tuple)):
        x = jnp.concatenate(x, axis=1)
    B, C1, L = x.shape

    # ---- static padding / tiling decisions ------------------------------------
    c1_pad = max(_round_up(C1, LANE), LANE)                    # lane-dense contraction
    block_b = max(SUBLANE, _round_up(min(block_b, B), SUBLANE))
    b_pad = _round_up(B, block_b)
    tile_l = max(SUBLANE, _round_up(min(tile_l, L), SUBLANE))

    itemsize = 2 if use_bf16 else 4

    def _working_set(tl):                                      # rough VMEM bytes
        return (2 * block_b * tl * c1_pad * itemsize           # double-buffered x
                + block_b * tl * C_HID * 4                     # f32 z tile
                + 2 * c1_pad * C_HID * itemsize                # weights
                + 2 * block_b * C_HID * 4                      # resident output block
                + 2 * C_HID * 4)                               # bias

    # Keep the working set v7x-safe (64 MiB VMEM chip) while preferring the
    # largest L tile that fits (big tiles amortize the ~0.35 us/step overhead).
    while _working_set(tile_l) > (24 << 20) and tile_l > SUBLANE:
        tile_l = max(SUBLANE, _round_up(tile_l // 2, SUBLANE))
    l_pad = _round_up(L, tile_l)

    # ---- layout: channel-last so C1_pad / 1280 live in the lane dimension ------
    xt = jnp.transpose(x, (0, 2, 1))                           # (B, L, C1)
    xt = jnp.pad(xt, ((0, b_pad - B), (0, l_pad - L), (0, c1_pad - C1)))
    w = jnp.pad(params["w_conv_fold"].T, ((0, c1_pad - C1), (0, 0)))  # (C1_pad, 1280)
    b = params["b_conv_fold"].reshape(1, C_HID).astype(jnp.float32)

    compute_dtype = jnp.bfloat16 if use_bf16 else jnp.float32
    xt = xt.astype(compute_dtype)
    w = w.astype(compute_dtype)

    kernel = functools.partial(_conv_pool_kernel,
                               inv_l=1.0 / L, pad_l=float(l_pad - L))
    grid = (b_pad // block_b, l_pad // tile_l)
    vmem_limit = int(min(max(2 * _working_set(tile_l), 32 << 20), 48 << 20))

    pooled = pl.pallas_call(
        kernel,
        out_shape=jax.ShapeDtypeStruct((b_pad, C_HID), jnp.float32),
        grid_spec=pltpu.PrefetchScalarGridSpec(
            num_scalar_prefetch=0,
            grid=grid,
            in_specs=[
                pl.BlockSpec((block_b, tile_l, c1_pad), lambda bi, li: (bi, li, 0)),
                pl.BlockSpec((c1_pad, C_HID), lambda bi, li: (0, 0)),
                pl.BlockSpec((1, C_HID), lambda bi, li: (0, 0)),
            ],
            out_specs=pl.BlockSpec((block_b, C_HID), lambda bi, li: (bi, 0)),
        ),
        compiler_params=pltpu.CompilerParams(
            dimension_semantics=("parallel", "arbitrary"),
            vmem_limit_bytes=vmem_limit,
        ),
    )(xt, w, b)

    # TODO(synk): Dropout(p=0.2, inplace=True) only acts in training mode; the
    # eval forward implemented here is the identity.
    return pooled[:B]


# ----------------------------------- params ------------------------------------
def init_params(key, c1, c2=None, k=1):
    """Conv1d(c1, 1280, k, bias=False) + BatchNorm1d(1280), folded for eval.

    (c2 is accepted for parity with the PyTorch constructor, but ClassifyV22's
    forward never projects to c2 — the head returns the pooled 1280-d feature.)
    """
    if k != 1:
        # TODO(synk): only the k=1 (pointwise) Conv1d used by this head is
        # implemented; a general k would need an im2col / windowed DMA.
        raise NotImplementedError("ClassifyV22 kernel supports k=1 only")
    ks = jax.random.split(key, 5)
    s = 0.05
    w_conv = jax.random.normal(ks[0], (C_HID, c1, k), jnp.float32) * s
    gamma = 1.0 + 0.1 * jax.random.normal(ks[1], (C_HID,), jnp.float32)
    beta = 0.1 * jax.random.normal(ks[2], (C_HID,), jnp.float32)
    mean = 0.1 * jax.random.normal(ks[3], (C_HID,), jnp.float32)
    var = 1.0 + 0.1 * jnp.abs(jax.random.normal(ks[4], (C_HID,), jnp.float32))
    inv = gamma / jnp.sqrt(var + 1e-3)                     # BN eps = 1e-3
    return dict(
        w_conv_fold=w_conv[:, :, 0] * inv[:, None],        # (1280, c1)
        b_conv_fold=beta - mean * inv,                     # (1280,)
    )


# ------------------------------ pure-JAX reference ------------------------------
def reference_forward(x, p):
    if isinstance(x, (list, tuple)):
        x = jnp.concatenate(x, axis=1)
    z = jnp.einsum('oc,bcl->bol', p["w_conv_fold"], x) + p["b_conv_fold"][None, :, None]
    z = z * jax.nn.sigmoid(z)                              # SiLU
    return jnp.mean(z, axis=2)                             # avg-pool(1)+flatten; drop=id


if __name__ == "__main__":
    key = jax.random.PRNGKey(0)
    kx, kp, kx2 = jax.random.split(key, 3)

    # Small shapes consistent with the head: x is (B, C1, L) in PyTorch NCL.
    B, C1, L, C2 = 2, 4, 16, 10
    x = jax.random.normal(kx, (B, C1, L), jnp.float32)
    params = init_params(kp, C1, C2)

    fwd = jax.jit(functools.partial(classify_v22_forward, tile_l=8))  # 2 L-tiles
    out = jax.block_until_ready(fwd(x, params))
    ref = reference_forward(x, params)
    assert out.shape == (B, C_HID)
    assert jnp.allclose(out, ref, atol=1e-2, rtol=1e-2), \
        float(jnp.max(jnp.abs(out - ref)))

    # Second check exercising the B / C1 / L padding paths (odd sizes).
    B2, C12, L2 = 3, 5, 13
    x2 = jax.random.normal(kx2, (B2, C12, L2), jnp.float32)
    params2 = init_params(kp, C12, C2)
    out2 = jax.block_until_ready(jax.jit(classify_v22_forward)(x2, params2))
    ref2 = reference_forward(x2, params2)
    assert out2.shape == (B2, C_HID)
    assert jnp.allclose(out2, ref2, atol=1e-2, rtol=1e-2), \
        float(jnp.max(jnp.abs(out2 - ref2)))

    print("KERNEL_OK")
</pallas_src>

<mosaic_0001>
module attributes {stable_mosaic.version = 11 : i64} {
  func.func @_conv_pool_kernel(%arg0: i32, %arg1: i32, %arg2: memref<8x8x128xbf16, #tpu.memory_space<vmem>>, %arg3: memref<128x1280xbf16, #tpu.memory_space<vmem>>, %arg4: memref<1x1280xf32, #tpu.memory_space<vmem>>, %arg5: memref<8x1280xf32, #tpu.memory_space<vmem>>) attributes {dimension_semantics = [#tpu.dimension_semantics<parallel>, #tpu.dimension_semantics<arbitrary>], iteration_bounds = array<i64: 1, 2>, scalar_prefetch = 0 : i64, scratch_operands = 0 : i64, tpu.core_type = #tpu.core_type<tc>, window_params = [{transform_indices = @transform_0, window_bounds = array<i64: 8, 8, 128>}, {pipeline_mode = #tpu.pipeline_mode<synchronous>, transform_indices = @transform_1, window_bounds = array<i64: 128, 1280>}, {pipeline_mode = #tpu.pipeline_mode<synchronous>, transform_indices = @transform_2, window_bounds = array<i64: 1, 1280>}, {transform_indices = @transform_3, window_bounds = array<i64: 8, 1280>}]} {
    %c0_i32 = arith.constant 0 : i32
    %0 = arith.cmpi eq, %arg1, %c0_i32 : i32
    %1 = arith.extui %0 : i1 to i32
    %c0_i32_0 = arith.constant 0 : i32
    %2 = arith.cmpi ne, %1, %c0_i32_0 : i32
    scf.if %2 {
      %cst_14 = arith.constant 0.000000e+00 : f32
      %24 = vector.broadcast %cst_14 : f32 to vector<8x1280xf32>
      %c0_15 = arith.constant 0 : index
      %c0_16 = arith.constant 0 : index
      %25 = vector.load %arg5[%c0_15, %c0_16] : memref<8x1280xf32, #tpu.memory_space<vmem>>, vector<8x1280xf32>
      tpu.vector_store %arg5[%c0_15, %c0_16], %24 {strides = array<i32>} : memref<8x1280xf32, #tpu.memory_space<vmem>>, vector<8x1280xf32>,
    } else {
    }
    %c0 = arith.constant 0 : index
    %c0_1 = arith.constant 0 : index
    %c0_2 = arith.constant 0 : index
    %3 = vector.load %arg2[%c0, %c0_1, %c0_2] : memref<8x8x128xbf16, #tpu.memory_space<vmem>>, vector<8x8x128xbf16>
    %4 = vector.shape_cast %3 : vector<8x8x128xbf16> to vector<64x128xbf16>
    %c0_3 = arith.constant 0 : index
    %c0_4 = arith.constant 0 : index
    %5 = vector.load %arg3[%c0_3, %c0_4] : memref<128x1280xbf16, #tpu.memory_space<vmem>>, vector<128x1280xbf16>
    %cst = arith.constant dense<0.000000e+00> : vector<64x1280xf32>
    %6 = tpu.matmul %4, %5, %cst {dimension_numbers = #tpu.dot_dimension_numbers<[1], [0], [0], [1], [0, 0, 1, 1], [], []>} : vector<64x128xbf16>, vector<128x1280xbf16>, vector<64x1280xf32> -> vector<64x1280xf32>
    %c0_5 = arith.constant 0 : index
    %c0_6 = arith.constant 0 : index
    %7 = vector.load %arg4[%c0_5, %c0_6] : memref<1x1280xf32, #tpu.memory_space<vmem>>, vector<1x1280xf32>
    %8 = vector.broadcast %7 : vector<1x1280xf32> to vector<64x1280xf32>
    %9 = arith.addf %6, %8 : vector<64x1280xf32>
    %10 = arith.negf %9 : vector<64x1280xf32>
    %11 = math.exp %10 : vector<64x1280xf32>
    %cst_7 = arith.constant 1.000000e+00 : f32
    %12 = vector.broadcast %cst_7 : f32 to vector<64x1280xf32>
    %13 = arith.addf %12, %11 : vector<64x1280xf32>
    %14 = arith.divf %12, %13 : vector<64x1280xf32>
    %15 = arith.mulf %9, %14 : vector<64x1280xf32>
    %c0_8 = arith.constant 0 : index
    %c0_9 = arith.constant 0 : index
    %16 = vector.load %arg5[%c0_8, %c0_9] : memref<8x1280xf32, #tpu.memory_space<vmem>>, vector<8x1280xf32>
    %17 = vector.shape_cast %15 : vector<64x1280xf32> to vector<8x8x1280xf32>
    %cst_10 = arith.constant dense<0.000000e+00> : vector<8x1280xf32>
    %18 = vector.multi_reduction <add>, %17, %cst_10 [1] : vector<8x8x1280xf32> to vector<8x1280xf32>
    %19 = arith.addf %16, %18 : vector<8x1280xf32>
    %c0_11 = arith.constant 0 : index
    %c0_12 = arith.constant 0 : index
    %20 = vector.load %arg5[%c0_11, %c0_12] : memref<8x1280xf32, #tpu.memory_space<vmem>>, vector<8x1280xf32>
    tpu.vector_store %arg5[%c0_11, %c0_12], %19 {strides = array<i32>} : memref<8x1280xf32, #tpu.memory_space<vmem>>, vector<8x1280xf32>,
    %c1_i32 = arith.constant 1 : i32
    %21 = arith.cmpi eq, %arg1, %c1_i32 : i32
    %22 = arith.extui %21 : i1 to i32
    %c0_i32_13 = arith.constant 0 : i32
    %23 = arith.cmpi ne, %22, %c0_i32_13 : i32
    scf.if %23 {
      %c0_14 = arith.constant 0 : index
      %c0_15 = arith.constant 0 : index
      %24 = vector.load %arg4[%c0_14, %c0_15] : memref<1x1280xf32, #tpu.memory_space<vmem>>, vector<1x1280xf32>
      %25 = arith.negf %24 : vector<1x1280xf32>
      %26 = math.exp %25 : vector<1x1280xf32>
      %cst_16 = arith.constant 1.000000e+00 : f32
      %27 = vector.broadcast %cst_16 : f32 to vector<1x1280xf32>
      %28 = arith.addf %27, %26 : vector<1x1280xf32>
      %29 = arith.divf %27, %28 : vector<1x1280xf32>
      %30 = arith.mulf %24, %29 : vector<1x1280xf32>
      %cst_17 = arith.constant 0.000000e+00 : f32
      %31 = vector.broadcast %cst_17 : f32 to vector<1x1280xf32>
      %32 = arith.mulf %30, %31 : vector<1x1280xf32>
      %c0_18 = arith.constant 0 : index
      %c0_19 = arith.constant 0 : index
      %33 = vector.load %arg5[%c0_18, %c0_19] : memref<8x1280xf32, #tpu.memory_space<vmem>>, vector<8x1280xf32>
      %34 = vector.broadcast %32 : vector<1x1280xf32> to vector<8x1280xf32>
      %35 = arith.subf %33, %34 : vector<8x1280xf32>
      %cst_20 = arith.constant 6.250000e-02 : f32
      %36 = vector.broadcast %cst_20 : f32 to vector<8x1280xf32>
      %37 = arith.mulf %35, %36 : vector<8x1280xf32>
      %c0_21 = arith.constant 0 : index
      %c0_22 = arith.constant 0 : index
      %38 = vector.load %arg5[%c0_21, %c0_22] : memref<8x1280xf32, #tpu.memory_space<vmem>>, vector<8x1280xf32>
      tpu.vector_store %arg5[%c0_21, %c0_22], %37 {strides = array<i32>} : memref<8x1280xf32, #tpu.memory_space<vmem>>, vector<8x1280xf32>,
    } else {
    }
    return
  }
  func.func @transform_0(%arg0: i32, %arg1: i32) -> (i32, i32, i32) {
    %c0_i32 = arith.constant 0 : i32
    %c0_i32_0 = arith.constant 0 : i32
    return %arg0, %arg1, %c0_i32 : i32, i32, i32
  }
  func.func @transform_1(%arg0: i32, %arg1: i32) -> (i32, i32) {
    %c0_i32 = arith.constant 0 : i32
    %c0_i32_0 = arith.constant 0 : i32
    %c0_i32_1 = arith.constant 0 : i32
    return %c0_i32, %c0_i32_0 : i32, i32
  }
  func.func @transform_2(%arg0: i32, %arg1: i32) -> (i32, i32) {
    %c0_i32 = arith.constant 0 : i32
    %c0_i32_0 = arith.constant 0 : i32
    %c0_i32_1 = arith.constant 0 : i32
    return %c0_i32, %c0_i32_0 : i32, i32
  }
  func.func @transform_3(%arg0: i32, %arg1: i32) -> (i32, i32) {
    %c0_i32 = arith.constant 0 : i32
    %c0_i32_0 = arith.constant 0 : i32
    return %arg0, %c0_i32 : i32, i32
  }
}

</mosaic_0001>

<bundles_post_ra>
// kernel: classify_v22_forward.1
= control target key start
LH: loop header
LB: loop body
LE: loop exit
PB: predicated region body
PF: predicated region fallthrough
CT: control target
= control target key end

     0   :  { %s3374_s12 = smov 0   ;;  %s3376_s13 = smov 0   ;;  %s4769_s0 = inlined_call_operand.vmem [shape: bf16[8,16,128], index: 0, kind: input, shape index: {}]   ;;  %s4770_s1 = inlined_call_operand.vmem [shape: bf16[128,1280], index: 1, kind: input, shape index: {}]   ;;  %s4771_s2 = inlined_call_operand.vmem [shape: f32[1,1280], index: 2, kind: input, shape index: {}]   ;;  %s4772_s3 = inlined_call_operand.vmem [shape: f32[8,1280], index: 3, kind: output, shape index: {}]  }
   0x1   :  { %s3378_s14 = smov 0   ;;  %s3380_s15 = smov 0  }
   0x2   :  { %s3382_s16 = smov 0  }
   0x3 LB: > { %s22_s17 = sadd.s32 1, %s3346_s15  ;;  %p41_p1 = scmp.ne.s32.totalorder %s3338_s13, %s3334_s12  ;;  %s3350_s16 = sphi %s3382_s16, %s13_s16   ;;  %s3346_s15 = sphi %s3380_s15, %s4944_s15   ;;  %s3342_s14 = sphi %s3378_s14, %s4943_s14   ;;  %s3338_s13 = sphi %s3376_s13, %s4942_s13   ;;  %s3334_s12 = sphi %s3374_s12, %s4941_s12  }
   0x4   : > { %p23_p0 = scmp.ge.s32.totalorder %s22_s17, 2  ;;  %p42_p2 = scmp.eq.s32.totalorder %s3350_s16, 0 }
   0x5   : > { %s34_s19 = sadd.s32 1, %s3338_s13  ;;  %p2626_p5 = scmp.ge.s32.totalorder %s3350_s16, 2 }
   0x6   : > { %s4946_s17 = smov (%p23_p0, %s22_s17), 0  ;;  %p43_p3 = por %p42_p2, %p41_p1 }
   0x7   : > { %s30_s18 = ssub.s32 %s3346_s15, %s4946_s17  ;;  %141 = sbr.rel (%p2626_p5) target bundleno = 23 (0x17), region = 24 }
   0x8   : > { %p32_p4 = scmp.eq.s32.totalorder %s30_s18, 0 }
   0xa   : > { %s3409_s20 = scalar_select %p32_p4, %s3338_s13, %s34_s19  }
   0xe   : > { %144 = sbr.rel (!%p43_p3) target bundleno = 23 (0x17), region = 28  ;;  %s146_s21 = sand.u32 (%p43_p3), 1, %s3338_s13  }
   0xf   : > { %s2628_s22 = sshll.u32 (%p43_p3), %s3346_s15, 2  ;;  %s2627_s23 = sshll.u32 (%p43_p3), %s146_s21, 5 }
  0x10   : > { %s153_s26 = scalar_lea.vmem (%p43_p3), %s4769_s0, %s2628_s22  ;;  %s148_s27 = scalar_lea.vmem (%p43_p3), [#allocation2], %s2627_s23 }
  0x11   : > { %v169_v0 = vld [vmem:[%s153_s26] sm:$0xf] (%p43_p3)  ;;  %v171_v1 = vld [vmem:[%s153_s26 + $0x8] sm:$0xf] (%p43_p3)  ;;  %v173_v2 = vld [vmem:[%s153_s26 + $0x10] sm:$0xf] (%p43_p3) }
  0x12   : > { %170 = vst [vmem:[%s148_s27] sm:$0xf] (%p43_p3), %v169_v0  ;;  %172 = vst [vmem:[%s148_s27 + $0x4] sm:$0xf] (%p43_p3), %v171_v1  ;;  %v175_v3 = vld [vmem:[%s153_s26 + $0x18] sm:$0xf] (%p43_p3) }
  0x13   : > { %v177_v4 = vld [vmem:[%s153_s26 + $0x20] sm:$0xf] (%p43_p3)  ;;  %174 = vst [vmem:[%s148_s27 + $0x8] sm:$0xf] (%p43_p3), %v173_v2  ;;  %176 = vst [vmem:[%s148_s27 + $0xc] sm:$0xf] (%p43_p3), %v175_v3 }
  0x14   : > { %178 = vst [vmem:[%s148_s27 + $0x10] sm:$0xf] (%p43_p3), %v177_v4  ;;  %v179_v5 = vld [vmem:[%s153_s26 + $0x28] sm:$0xf] (%p43_p3)  ;;  %v181_v6 = vld [vmem:[%s153_s26 + $0x30] sm:$0xf] (%p43_p3) }
  0x15   : > { %v183_v7 = vld [vmem:[%s153_s26 + $0x38] sm:$0xf]  ;;  %180 = vst [vmem:[%s148_s27 + $0x14] sm:$0xf] %v179_v5  ;;  %182 = vst [vmem:[%s148_s27 + $0x18] sm:$0xf] %v181_v6 }
  0x16   : > { %184 = vst [vmem:[%s148_s27 + $0x1c] sm:$0xf] %v183_v7 }
  0x17 PF: > { %p2629_p6 = scmp.ge.s32.totalorder %s3350_s16, 1  ;;  %p222_p7 = scmp.lt.s32.totalorder %s3350_s16, 3 }
  0x19   : > { %p223_p8 = pnand %p2629_p6, %p222_p7 }
  0x1b   : > { %226 = sbr.rel (%p223_p8) target bundleno = 598 (0x256), region = 69 }
  0x22   : > { %s229_s28 = sand.u32 1, %s3334_s12   ;;  %p2631_p9 = scmp.ne.s32.totalorder %s3342_s14, 0 }
  0x23   : > { %s2630_s29 = sshll.u32 %s229_s28, 5  ;;  %v3352_v8 = vmov (!%p2631_p9), 0.0  }
  0x24   : > { %s3420_s30 = scalar_lea.vmem [#allocation2], %s2630_s29  ;;  %262 = sbr.rel (%p2631_p9) target bundleno = 43 (0x2b), region = 77  ;;  %263 = vst [vmem:[%s4772_s3] sm:$0xff] (!%p2631_p9), %v3352_v8  ;;  %264 = vst [vmem:[%s4772_s3 + $0x8] sm:$0xff] (!%p2631_p9), %v3352_v8 }
  0x25   : > { %265 = vst [vmem:[%s4772_s3 + $0x10] sm:$0xff] (!%p2631_p9), %v3352_v8  ;;  %266 = vst [vmem:[%s4772_s3 + $0x18] sm:$0xff] (!%p2631_p9), %v3352_v8 }
  0x26   : > { %267 = vst [vmem:[%s4772_s3 + $0x20] sm:$0xff] (!%p2631_p9), %v3352_v8  ;;  %268 = vst [vmem:[%s4772_s3 + $0x28] sm:$0xff] (!%p2631_p9), %v3352_v8 }
  0x27   : > { %269 = vst [vmem:[%s4772_s3 + $0x30] sm:$0xff] (!%p2631_p9), %v3352_v8  ;;  %270 = vst [vmem:[%s4772_s3 + $0x38] sm:$0xff] (!%p2631_p9), %v3352_v8 }
  0x28   : > { %271 = vst [vmem:[%s4772_s3 + $0x40] sm:$0xff] (!%p2631_p9), %v3352_v8  ;;  %272 = vst [vmem:[%s4772_s3 + $0x48] sm:$0xff] (!%p2631_p9), %v3352_v8 }
  0x2b PF: > { %v2860_v9 = vld [vmem:[%s4770_s1 + $0x4] ss:$40 sps:$4 sm:$0xff]   ;;  %v3353_v11 = vmov 0   ;;  %v2864_v12 = vld [vmem:[%s4770_s1] ss:$40 sps:$4 sm:$0xff]   ;;  %v3620_v62 = vld [vmem:[%s3420_s30 + $0x10] sm:$0xff]  }
  0x2c   : > { %v2862_v10 = vld [vmem:[%s4770_s1 + $0xc] ss:$40 sps:$4 sm:$0xff]   ;;  %871 = vmatprep.mubr.bf16.mxu0 %v3353_v11  ;;  %944 = vmatprep.mubr.bf16.mxu1 %v3353_v11  ;;  %v2865_v13 = vld [vmem:[%s4770_s1 + $0x8] ss:$40 sps:$4 sm:$0xff]   ;;  %v2868_v15 = vld [vmem:[%s4770_s1 + $0x5c] ss:$40 sps:$4 sm:$0xff]  }
  0x2d   : > { %839 = vmatprep.subr.bf16.mxu0 %v2860_v9  ;;  %912 = vmatprep.subr.bf16.mxu1 %v2862_v10  ;;  %v2866_v14 = vld [vmem:[%s4770_s1 + $0x54] ss:$40 sps:$4 sm:$0xff]   ;;  %v2870_v16 = vld [vmem:[%s4770_s1 + $0x50] ss:$40 sps:$4 sm:$0xff]   ;;  %v2872_v18 = vld [vmem:[%s4770_s1 + $0xa4] ss:$40 sps:$4 sm:$0xff]  }
  0x2e   : > { %840 = vmatpush1.bf16.msra.mxu0 %v2864_v12  ;;  %913 = vmatpush1.bf16.msra.mxu1 %v2865_v13  ;;  %v2871_v17 = vld [vmem:[%s4770_s1 + $0x58] ss:$40 sps:$4 sm:$0xff]   ;;  %v2874_v19 = vld [vmem:[%s4770_s1 + $0xac] ss:$40 sps:$4 sm:$0xff]   ;;  %v2877_v21 = vld [vmem:[%s4770_s1 + $0xa8] ss:$40 sps:$4 sm:$0xff]  }
  0x2f   : > { %841 = vmatprep.subr.bf16.mxu0 %v2866_v14  ;;  %914 = vmatprep.subr.bf16.mxu1 %v2868_v15  ;;  %v2876_v20 = vld [vmem:[%s4770_s1 + $0xa0] ss:$40 sps:$4 sm:$0xff]   ;;  %v2878_v22 = vld [vmem:[%s4770_s1 + $0xf4] ss:$40 sps:$4 sm:$0xff]   ;;  %v2882_v24 = vld [vmem:[%s4770_s1 + $0xf0] ss:$40 sps:$4 sm:$0xff]  }
  0x30   : > { %v2880_v23 = vld [vmem:[%s4770_s1 + $0xfc] ss:$40 sps:$4 sm:$0xff]   ;;  %v2883_v25 = vld [vmem:[%s4770_s1 + $0xf8] ss:$40 sps:$4 sm:$0xff]   ;;  %v2886_v27 = vld [vmem:[%s4770_s1 + $0x14c] ss:$40 sps:$4 sm:$0xff]  }
  0x31   : > { %v2884_v26 = vld [vmem:[%s4770_s1 + $0x144] ss:$40 sps:$4 sm:$0xff]   ;;  %v2888_v28 = vld [vmem:[%s4770_s1 + $0x140] ss:$40 sps:$4 sm:$0xff]   ;;  %v2890_v30 = vld [vmem:[%s4770_s1 + $0x194] ss:$40 sps:$4 sm:$0xff]  }
  0x32   : > { %842 = vmatpush1.bf16.msra.mxu0 %v2870_v16  ;;  %915 = vmatpush1.bf16.msra.mxu1 %v2871_v17  ;;  %v2889_v29 = vld [vmem:[%s4770_s1 + $0x148] ss:$40 sps:$4 sm:$0xff]   ;;  %v2892_v31 = vld [vmem:[%s4770_s1 + $0x19c] ss:$40 sps:$4 sm:$0xff]   ;;  %v2895_v33 = vld [vmem:[%s4770_s1 + $0x198] ss:$40 sps:$4 sm:$0xff]  }
  0x33   : > { %843 = vmatprep.subr.bf16.mxu0 %v2872_v18  ;;  %916 = vmatprep.subr.bf16.mxu1 %v2874_v19  ;;  %v2894_v32 = vld [vmem:[%s4770_s1 + $0x190] ss:$40 sps:$4 sm:$0xff]   ;;  %v2896_v34 = vld [vmem:[%s4770_s1 + $0x1e4] ss:$40 sps:$4 sm:$0xff]   ;;  %v2900_v36 = vld [vmem:[%s4770_s1 + $0x1e0] ss:$40 sps:$4 sm:$0xff]  }
  0x34   : > { %v2898_v35 = vld [vmem:[%s4770_s1 + $0x1ec] ss:$40 sps:$4 sm:$0xff]   ;;  %v2901_v37 = vld [vmem:[%s4770_s1 + $0x1e8] ss:$40 sps:$4 sm:$0xff]   ;;  %v2904_v39 = vld [vmem:[%s4770_s1 + $0x23c] ss:$40 sps:$4 sm:$0xff]  }
  0x35   : > { %v2902_v38 = vld [vmem:[%s4770_s1 + $0x234] ss:$40 sps:$4 sm:$0xff]   ;;  %v2906_v40 = vld [vmem:[%s4770_s1 + $0x230] ss:$40 sps:$4 sm:$0xff]   ;;  %v3558_v44 = vld [vmem:[%s3420_s30] sm:$0xff]   ;;  %vm2334_vm0 = vcmask 1041409  }
  0x36   : > { %844 = vmatpush1.bf16.msra.mxu0 %v2876_v20  ;;  %917 = vmatpush1.bf16.msra.mxu1 %v2877_v21  ;;  %v2907_v41 = vld [vmem:[%s4770_s1 + $0x238] ss:$40 sps:$4 sm:$0xff]   ;;  %v2911_v42 = vld [vmem:[%s4770_s1 + $0x14] ss:$40 sps:$4 sm:$0xff]   ;;  %v2917_v47 = vld [vmem:[%s4770_s1 + $0x64] ss:$40 sps:$4 sm:$0xff]  }
  0x37   : > { %845 = vmatprep.subr.bf16.mxu0 %v2878_v22  ;;  %918 = vmatprep.subr.bf16.mxu1 %v2880_v23  ;;  %v2914_v43 = vld [vmem:[%s4770_s1 + $0x1c] ss:$40 sps:$4 sm:$0xff]   ;;  %v2909_v45 = vld [vmem:[%s4770_s1 + $0x10] ss:$40 sps:$4 sm:$0xff]   ;;  %v2920_v48 = vld [vmem:[%s4770_s1 + $0x6c] ss:$40 sps:$4 sm:$0xff]  }
  0x38   : > { %v2912_v46 = vld [vmem:[%s4770_s1 + $0x18] ss:$40 sps:$4 sm:$0xff]   ;;  %v2918_v50 = vld [vmem:[%s4770_s1 + $0x68] ss:$40 sps:$4 sm:$0xff]   ;;  %v2924_v51 = vld [vmem:[%s4770_s1 + $0xb4] ss:$40 sps:$4 sm:$0xff]  }
  0x39   : > { %v2915_v49 = vld [vmem:[%s4770_s1 + $0x60] ss:$40 sps:$4 sm:$0xff]   ;;  %v2927_v52 = vld [vmem:[%s4770_s1 + $0xbc] ss:$40 sps:$4 sm:$0xff]   ;;  %v2922_v54 = vld [vmem:[%s4770_s1 + $0xb0] ss:$40 sps:$4 sm:$0xff]  }
  0x3a   : > { %846 = vmatpush1.bf16.msra.mxu0 %v2882_v24  ;;  %919 = vmatpush1.bf16.msra.mxu1 %v2883_v25  ;;  %v3589_v53 = vld [vmem:[%s3420_s30 + $0x8] sm:$0xff]   ;;  %v2925_v55 = vld [vmem:[%s4770_s1 + $0xb8] ss:$40 sps:$4 sm:$0xff]   ;;  %v2937_v60 = vld [vmem:[%s4770_s1 + $0x154] ss:$40 sps:$4 sm:$0xff]   ;;  %vm2336_vm1 = vcmask 1042434  }
  0x3b   : > { %847 = vmatprep.subr.bf16.mxu0 %v2884_v26  ;;  %920 = vmatprep.subr.bf16.mxu1 %v2886_v27  ;;  %v2930_v56 = vld [vmem:[%s4770_s1 + $0x104] ss:$40 sps:$4 sm:$0xff]   ;;  %v2928_v58 = vld [vmem:[%s4770_s1 + $0x100] ss:$40 sps:$4 sm:$0xff]   ;;  %v2935_v63 = vld [vmem:[%s4770_s1 + $0x150] ss:$40 sps:$4 sm:$0xff]  }
  0x3c   : > { %v2933_v57 = vld [vmem:[%s4770_s1 + $0x10c] ss:$40 sps:$4 sm:$0xff]   ;;  %v2931_v59 = vld [vmem:[%s4770_s1 + $0x108] ss:$40 sps:$4 sm:$0xff]   ;;  %v2940_v61 = vld [vmem:[%s4770_s1 + $0x15c] ss:$40 sps:$4 sm:$0xff]  }
  0x3d   : > { %v2938_v0 = vld [vmem:[%s4770_s1 + $0x158] ss:$40 sps:$4 sm:$0xff]   ;;  %v2943_v1 = vld [vmem:[%s4770_s1 + $0x1a4] ss:$40 sps:$4 sm:$0xff]   ;;  %v2944_v4 = vld [vmem:[%s4770_s1 + $0x1a8] ss:$40 sps:$4 sm:$0xff]  }
  0x3e   : > { %848 = vmatpush1.bf16.msra.mxu0 %v2888_v28  ;;  %921 = vmatpush1.bf16.msra.mxu1 %v2889_v29  ;;  %v2946_v2 = vld [vmem:[%s4770_s1 + $0x1ac] ss:$40 sps:$4 sm:$0xff]   ;;  %v2941_v3 = vld [vmem:[%s4770_s1 + $0x1a0] ss:$40 sps:$4 sm:$0xff]   ;;  %v2953_v6 = vld [vmem:[%s4770_s1 + $0x1fc] ss:$40 sps:$4 sm:$0xff]  }
  0x3f   : > { %849 = vmatprep.subr.bf16.mxu0 %v2890_v30  ;;  %922 = vmatprep.subr.bf16.mxu1 %v2892_v31  ;;  %v2950_v5 = vld [vmem:[%s4770_s1 + $0x1f4] ss:$40 sps:$4 sm:$0xff]   ;;  %v2948_v8 = vld [vmem:[%s4770_s1 + $0x1f0] ss:$40 sps:$4 sm:$0xff]   ;;  %v2956_v10 = vld [vmem:[%s4770_s1 + $0x244] ss:$40 sps:$4 sm:$0xff]   ;;  %v365_v31 = vlaneseq }
  0x40   : > { %v3651_v7 = vld [vmem:[%s3420_s30 + $0x18] sm:$0xff]   ;;  %v2959_v12 = vld [vmem:[%s4770_s1 + $0x24c] ss:$40 sps:$4 sm:$0xff]   ;;  %v2954_v13 = vld [vmem:[%s4770_s1 + $0x240] ss:$40 sps:$4 sm:$0xff]   ;;  %vm2338_vm2 = vcmask 1043459  }
  0x41   : > { %v2951_v9 = vld [vmem:[%s4770_s1 + $0x1f8] ss:$40 sps:$4 sm:$0xff]   ;;  %v2957_v14 = vld [vmem:[%s4770_s1 + $0x248] ss:$40 sps:$4 sm:$0xff]   ;;  %v2962_v15 = vld [vmem:[%s4770_s1 + $0x24] ss:$40 sps:$4 sm:$0xff]  }
  0x42   : > { %850 = vmatpush1.bf16.msra.mxu0 %v2894_v32  ;;  %923 = vmatpush1.bf16.msra.mxu1 %v2895_v33  ;;  %v2960_v16 = vld [vmem:[%s4770_s1 + $0x20] ss:$40 sps:$4 sm:$0xff]   ;;  %v2965_v17 = vld [vmem:[%s4770_s1 + $0x74] ss:$40 sps:$4 sm:$0xff]   ;;  %v2963_v18 = vld [vmem:[%s4770_s1 + $0x70] ss:$40 sps:$4 sm:$0xff]  }
  0x43   : > { %851 = vmatprep.subr.bf16.mxu0 %v2896_v34  ;;  %924 = vmatprep.subr.bf16.mxu1 %v2898_v35  ;;  %v2968_v19 = vld [vmem:[%s4770_s1 + $0xc4] ss:$40 sps:$4 sm:$0xff]   ;;  %v2966_v20 = vld [vmem:[%s4770_s1 + $0xc0] ss:$40 sps:$4 sm:$0xff]   ;;  %v2971_v21 = vld [vmem:[%s4770_s1 + $0x114] ss:$40 sps:$4 sm:$0xff]  }
  0x44   : > { %v2969_v22 = vld [vmem:[%s4770_s1 + $0x110] ss:$40 sps:$4 sm:$0xff]   ;;  %v2974_v23 = vld [vmem:[%s4770_s1 + $0x164] ss:$40 sps:$4 sm:$0xff]   ;;  %v2972_v24 = vld [vmem:[%s4770_s1 + $0x160] ss:$40 sps:$4 sm:$0xff]  }
  0x45   : > { %v2977_v25 = vld [vmem:[%s4770_s1 + $0x1b4] ss:$40 sps:$4 sm:$0xff]   ;;  %v2975_v26 = vld [vmem:[%s4770_s1 + $0x1b0] ss:$40 sps:$4 sm:$0xff]   ;;  %v2980_v27 = vld [vmem:[%s4770_s1 + $0x204] ss:$40 sps:$4 sm:$0xff]  }
  0x46   : > { %852 = vmatpush1.bf16.msra.mxu0 %v2900_v36  ;;  %925 = vmatpush1.bf16.msra.mxu1 %v2901_v37  ;;  %v2978_v28 = vld [vmem:[%s4770_s1 + $0x200] ss:$40 sps:$4 sm:$0xff]   ;;  %v2983_v29 = vld [vmem:[%s4770_s1 + $0x254] ss:$40 sps:$4 sm:$0xff]   ;;  %v2981_v30 = vld [vmem:[%s4770_s1 + $0x250] ss:$40 sps:$4 sm:$0xff]  }
  0x47   : > { %853 = vmatprep.subr.bf16.mxu0 %v2902_v38  ;;  %926 = vmatprep.subr.bf16.mxu1 %v2904_v39  ;;  %v3745_v32 = vshrl.u32 %v365_v31, 7  ;;  %v3754_v35 = vld [vmem:[%s4771_s2] sm:$0xff]  ;;  %vm2340_vm3 = vcmask 1044484   ;;  %vm2342_vm4 = vcmask 1045509   ;;  %vm2344_vm5 = vcmask 1046534   ;;  %p2796_p10 = scmp.ne.s32.totalorder %s3342_s14, 1 }
  0x48   : > { %vm2346_vm6 = vcmask 1047559  }
  0x49   : > { %4807 = vst [vmem:[#allocation3_spill] sm:$0xff] %v3745_v32  ;;  %v3748_v33 = vsub.s32 0, %v3745_v32  ;;  %v4778_v34 = vsub.s32 2, %v3745_v32  ;;  %v3757_v36 = vsub.s32 1, %v3745_v32 }
  0x4a   : > { %854 = vmatpush1.bf16.msra.mxu0 %v2906_v40  ;;  %927 = vmatpush1.bf16.msra.mxu1 %v2907_v41 }
  0x4b   : > { %985 = vmatprep.subr.bf16.mxu0 %v2911_v42  ;;  %1058 = vmatprep.subr.bf16.mxu1 %v2914_v43  ;;  %4808 = vst [vmem:[#allocation4_spill] sm:$0xff] %v3748_v33  ;;  %4809 = vst [vmem:[#allocation5_spill] sm:$0xff] %v3757_v36  ;;  %v3762_v37 = vrot.slane %v3754_v35, %v3748_v33  ;;  %v3767_v38 = vrot.slane %v3754_v35, %v4778_v34 }
  0x4c   : > { %v3771_v39 = vrot.slane %v3754_v35, %v3757_v36 }
  0x4d   : > { %872 = vmatmul.mubr.bf16.vlgmr.msra.gmra.mrb[0].mxu0 %v3558_v44  ;;  %945 = vmatmul.mubr.bf16.vlgmr.msra.gmra.mrb[0].mxu1 %v3558_v44 }
  0x4e   : > { %986 = vmatpush1.bf16.msra.mxu0 %v2909_v45  ;;  %1059 = vmatpush1.bf16.msra.mxu1 %v2912_v46 }
  0x4f   : > { %987 = vmatprep.subr.bf16.mxu0 %v2917_v47  ;;  %1060 = vmatprep.subr.bf16.mxu1 %v2920_v48 }
  0x50   : > { %881 = vmatprep.mubr.bf16.mxu0 %v3353_v11  ;;  %954 = vmatprep.mubr.bf16.mxu1 %v3353_v11 }
  0x52   : > { %988 = vmatpush1.bf16.msra.mxu0 %v2915_v49  ;;  %1061 = vmatpush1.bf16.msra.mxu1 %v2918_v50 }
  0x53   : > { %989 = vmatprep.subr.bf16.mxu0 %v2924_v51  ;;  %1062 = vmatprep.subr.bf16.mxu1 %v2927_v52 }
  0x55   : > { %882 = vmatmul.mubr.bf16.gmra.mrb[4].mxu0 %v3589_v53  ;;  %955 = vmatmul.mubr.bf16.gmra.mrb[4].mxu1 %v3589_v53 }
  0x56   : > { %990 = vmatpush1.bf16.msra.mxu0 %v2922_v54  ;;  %1063 = vmatpush1.bf16.msra.mxu1 %v2925_v55 }
  0x57   : > { %991 = vmatprep.subr.bf16.mxu0 %v2930_v56  ;;  %1064 = vmatprep.subr.bf16.mxu1 %v2933_v57 }
  0x58   : > { %891 = vmatprep.mubr.bf16.mxu0 %v3353_v11  ;;  %964 = vmatprep.mubr.bf16.mxu1 %v3353_v11 }
  0x5a   : > { %992 = vmatpush1.bf16.msra.mxu0 %v2928_v58  ;;  %1065 = vmatpush1.bf16.msra.mxu1 %v2931_v59 }
  0x5b   : > { %993 = vmatprep.subr.bf16.mxu0 %v2937_v60  ;;  %1066 = vmatprep.subr.bf16.mxu1 %v2940_v61 }
  0x5d   : > { %892 = vmatmul.mubr.bf16.gmra.mrb[8].mxu0 %v3620_v62  ;;  %965 = vmatmul.mubr.bf16.gmra.mrb[8].mxu1 %v3620_v62 }
  0x5e   : > { %994 = vmatpush1.bf16.msra.mxu0 %v2935_v63  ;;  %1067 = vmatpush1.bf16.msra.mxu1 %v2938_v0 }
  0x5f   : > { %995 = vmatprep.subr.bf16.mxu0 %v2943_v1  ;;  %1068 = vmatprep.subr.bf16.mxu1 %v2946_v2 }
  0x60   : > { %901 = vmatprep.mubr.bf16.mxu0 %v3353_v11  ;;  %974 = vmatprep.mubr.bf16.mxu1 %v3353_v11 }
  0x62   : > { %996 = vmatpush1.bf16.msra.mxu0 %v2941_v3  ;;  %1069 = vmatpush1.bf16.msra.mxu1 %v2944_v4  ;;  %v4776_v3 = vsub.s32 4, %v3745_v32  ;;  %v4774_v4 = vsub.s32 6, %v3745_v32 }
  0x63   : > { %997 = vmatprep.subr.bf16.mxu0 %v2950_v5  ;;  %1070 = vmatprep.subr.bf16.mxu1 %v2953_v6 }
  0x65   : > { %902 = vmatmul.mubr.bf16.gmra.mrb[12].mxu0 %v3651_v7  ;;  %975 = vmatmul.mubr.bf16.gmra.mrb[12].mxu1 %v3651_v7 }
  0x66   : > { %998 = vmatpush1.bf16.msra.mxu0 %v2948_v8  ;;  %1071 = vmatpush1.bf16.msra.mxu1 %v2951_v9  ;;  %v4775_v9 = vsub.s32 5, %v3745_v32 }
  0x67   : > { %999 = vmatprep.subr.bf16.mxu0 %v2956_v10  ;;  %1072 = vmatprep.subr.bf16.mxu1 %v2959_v12 }
  0x68   : > { %1017 = vmatprep.mubr.bf16.mxu0 %v3353_v11  ;;  %1090 = vmatprep.mubr.bf16.mxu1 %v3353_v11  ;;  %v3859_v31 = vrot.slane %v3754_v35, %v4775_v9 }
  0x6a   : > { %1000 = vmatpush1.bf16.msra.mxu0 %v2954_v13  ;;  %1073 = vmatpush1.bf16.msra.mxu1 %v2957_v14 }
  0x6b   : > { %1131 = vmatprep.subr.bf16.mxu0 %v2962_v15  ;;  %2802 = vmatprep.subr.bf16.mxu1 %v2962_v15  ;;  %v4773_v15 = vsub.s32 7, %v3745_v32 }
  0x6d   : > { %1018 = vmatmul.mubr.bf16.vlgmr.msra.gmra.mrb[16].mxu0 %v3558_v44  ;;  %1091 = vmatmul.mubr.bf16.vlgmr.msra.gmra.mrb[16].mxu1 %v3558_v44 }
  0x6e   : > { %1132 = vmatpush1.bf16.msra.mxu0 %v2960_v16  ;;  %2810 = vmatpush1.bf16.msra.mxu1 %v2960_v16 }
  0x6f   : > { %1133 = vmatprep.subr.bf16.mxu0 %v2965_v17  ;;  %2803 = vmatprep.subr.bf16.mxu1 %v2965_v17 }
  0x70   : > { %1027 = vmatprep.mubr.bf16.mxu0 %v3353_v11  ;;  %1100 = vmatprep.mubr.bf16.mxu1 %v3353_v11 }
  0x72   : > { %1134 = vmatpush1.bf16.msra.mxu0 %v2963_v18  ;;  %2811 = vmatpush1.bf16.msra.mxu1 %v2963_v18 }
  0x73   : > { %1135 = vmatprep.subr.bf16.mxu0 %v2968_v19  ;;  %2804 = vmatprep.subr.bf16.mxu1 %v2968_v19 }
  0x75   : > { %1028 = vmatmul.mubr.bf16.gmra.mrb[20].mxu0 %v3589_v53  ;;  %1101 = vmatmul.mubr.bf16.gmra.mrb[20].mxu1 %v3589_v53 }
  0x76   : > { %1136 = vmatpush1.bf16.msra.mxu0 %v2966_v20  ;;  %2812 = vmatpush1.bf16.msra.mxu1 %v2966_v20 }
  0x77   : > { %1137 = vmatprep.subr.bf16.mxu0 %v2971_v21  ;;  %2805 = vmatprep.subr.bf16.mxu1 %v2971_v21 }
  0x78   : > { %1037 = vmatprep.mubr.bf16.mxu0 %v3353_v11  ;;  %1110 = vmatprep.mubr.bf16.mxu1 %v3353_v11 }
  0x7a   : > { %1138 = vmatpush1.bf16.msra.mxu0 %v2969_v22  ;;  %2813 = vmatpush1.bf16.msra.mxu1 %v2969_v22 }
  0x7b   : > { %1139 = vmatprep.subr.bf16.mxu0 %v2974_v23  ;;  %2806 = vmatprep.subr.bf16.mxu1 %v2974_v23 }
  0x7d   : > { %1038 = vmatmul.mubr.bf16.gmra.mrb[24].mxu0 %v3620_v62  ;;  %1111 = vmatmul.mubr.bf16.gmra.mrb[24].mxu1 %v3620_v62 }
  0x7e   : > { %1140 = vmatpush1.bf16.msra.mxu0 %v2972_v24  ;;  %2814 = vmatpush1.bf16.msra.mxu1 %v2972_v24 }
  0x7f   : > { %1141 = vmatprep.subr.bf16.mxu0 %v2977_v25  ;;  %2807 = vmatprep.subr.bf16.mxu1 %v2977_v25 }
  0x80   : > { %1047 = vmatprep.mubr.bf16.mxu0 %v3353_v11  ;;  %1120 = vmatprep.mubr.bf16.mxu1 %v3353_v11 }
  0x82   : > { %1142 = vmatpush1.bf16.msra.mxu0 %v2975_v26  ;;  %2815 = vmatpush1.bf16.msra.mxu1 %v2975_v26 }
  0x83   : > { %1143 = vmatprep.subr.bf16.mxu0 %v2980_v27  ;;  %2808 = vmatprep.subr.bf16.mxu1 %v2980_v27  ;;  %v3846_v27 = vrot.slane %v3754_v35, %v4776_v3 }
  0x85   : > { %1048 = vmatmul.mubr.bf16.gmra.mrb[28].mxu0 %v3651_v7  ;;  %1121 = vmatmul.mubr.bf16.gmra.mrb[28].mxu1 %v3651_v7 }
  0x86   : > { %1144 = vmatpush1.bf16.msra.mxu0 %v2978_v28  ;;  %2816 = vmatpush1.bf16.msra.mxu1 %v2978_v28 }
  0x87   : > { %1145 = vmatprep.subr.bf16.mxu0 %v2983_v29  ;;  %2809 = vmatprep.subr.bf16.mxu1 %v2983_v29 }
  0x88   : > { %1163 = vmatprep.mubr.bf16.mxu0 %v3353_v11  ;;  %1183 = vmatprep.mubr.bf16.mxu1 %v3353_v11 }
  0x8a   : > { %1146 = vmatpush1.bf16.msra.mxu0 %v2981_v30  ;;  %2817 = vmatpush1.bf16.msra.mxu1 %v2981_v30  ;;  %v3854_v30 = vrot.slane %v3754_v35, %v4774_v4 }
  0x8d   : > { %1164 = vmatmul.mubr.bf16.vlgmr.msra.gmra.mrb[32].mxu0 %v3558_v44  ;;  %1184 = vmatmul.mubr.bf16.vlgmr.msra.gmra.mrb[32].mxu1 %v3620_v62 }
  0x8e   : > { %1173 = vmatprep.mubr.bf16.mxu0 %v3353_v11  ;;  %1193 = vmatprep.mubr.bf16.mxu1 %v3353_v11  ;;  %v4777_v11 = vsub.s32 3, %v3745_v32 }
  0x90   : > { %v3776_v40 = vrot.slane %v3754_v35, %v4777_v11 }
  0x95   : > { %1174 = vmatmul.mubr.bf16.gmra.mrb[36].mxu0 %v3589_v53  ;;  %1194 = vmatmul.mubr.bf16.gmra.mrb[36].mxu1 %v3651_v7 }
 0x120   : > { %v873_v41 = vpop.f32.mrb[0].mxu0  ;;  %v946_v42 = vpop.f32.mrb[0].mxu1 }
 0x121   : > { %v3779_v43 = vadd.f32 %v873_v41, %v3762_v37  ;;  %v3782_v44 = vadd.f32 %v946_v42, %v3767_v38  ;;  %v875_v45 = vpop.f32.mrb[1].mxu0  ;;  %v948_v46 = vpop.f32.mrb[1].mxu1 }
 0x122   : > { %v3785_v47 = vadd.f32 %v875_v45, %v3771_v39  ;;  %v3788_v48 = vadd.f32 %v948_v46, %v3776_v40  ;;  %v877_v49 = vpop.f32.mrb[2].mxu0  ;;  %v950_v50 = vpop.f32.mrb[2].mxu1 }
 0x123   : > { %v2716_v51 = vmul.f32 -1.442695, %v3779_v43  ;;  %v2718_v52 = vmul.f32 -1.442695, %v3782_v44  ;;  %v3793_v53 = vadd.f32 %v877_v49, %v3762_v37  ;;  %v3796_v54 = vadd.f32 %v950_v50, %v3767_v38  ;;  %v879_v55 = vpop.f32.mrb[3].mxu0  ;;  %v952_v56 = vpop.f32.mrb[3].mxu1 }
 0x124   : > { %v2717_v57 = vmul.f32 -1.442695, %v3785_v47  ;;  %v2719_v58 = vmul.f32 -1.442695, %v3788_v48  ;;  %v3801_v59 = vadd.f32 %v879_v55, %v3771_v39  ;;  %v3804_v60 = vadd.f32 %v952_v56, %v3776_v40 }
 0x125   : > { %2984 = vpow2.f32 %v2716_v51  ;;  %v2726_v61 = vmul.f32 -1.442695, %v3793_v53  ;;  %v2728_v62 = vmul.f32 -1.442695, %v3796_v54  ;;  %v3867_v50 = vrot.slane %v3754_v35, %v4773_v15 }
 0x126   : > { %2986 = vpow2.f32 %v2718_v52  ;;  %v2727_v63 = vmul.f32 -1.442695, %v3801_v59  ;;  %v2729_v0 = vmul.f32 -1.442695, %v3804_v60 }
 0x127   : > { %2988 = vpow2.f32 %v2717_v57 }
 0x128   : > { %2990 = vpow2.f32 %v2719_v58  ;;  %v883_v1 = vpop.f32.mrb[4].mxu0  ;;  %v956_v2 = vpop.f32.mrb[4].mxu1 }
 0x129   : > { %2992 = vpow2.f32 %v2726_v61  ;;  %v3813_v5 = vadd.f32 %v883_v1, %v3762_v37  ;;  %v3816_v6 = vadd.f32 %v956_v2, %v3767_v38  ;;  %v885_v7 = vpop.f32.mrb[5].mxu0  ;;  %v958_v8 = vpop.f32.mrb[5].mxu1 }
 0x12a   : > { %2994 = vpow2.f32 %v2728_v62  ;;  %v3820_v10 = vadd.f32 %v885_v7, %v3771_v39  ;;  %v3823_v12 = vadd.f32 %v958_v8, %v3776_v40  ;;  %v887_v13 = vpop.f32.mrb[6].mxu0  ;;  %v960_v14 = vpop.f32.mrb[6].mxu1 }
 0x12b   : > { %2996 = vpow2.f32 %v2727_v63  ;;  %v2736_v16 = vmul.f32 -1.442695, %v3813_v5  ;;  %v2738_v17 = vmul.f32 -1.442695, %v3816_v6  ;;  %v3829_v18 = vadd.f32 %v887_v13, %v3762_v37  ;;  %v889_v19 = vpop.f32.mrb[7].mxu0  ;;  %v962_v20 = vpop.f32.mrb[7].mxu1 }
 0x12c   : > { %2998 = vpow2.f32 %v2729_v0  ;;  %v2737_v21 = vmul.f32 -1.442695, %v3820_v10  ;;  %v2739_v22 = vmul.f32 -1.442695, %v3823_v12  ;;  %v3834_v23 = vadd.f32 %v960_v14, %v3767_v38 }
 0x12d   : > { %3000 = vpow2.f32 %v2736_v16  ;;  %v2746_v24 = vmul.f32 -1.442695, %v3829_v18  ;;  %v3838_v25 = vadd.f32 %v889_v19, %v3771_v39  ;;  %v3841_v26 = vadd.f32 %v962_v20, %v3776_v40 }
 0x12e   : > { %3002 = vpow2.f32 %v2738_v17  ;;  %v3849_v29 = vmul.f32 -1.442695, %v3834_v23 }
 0x12f   : > { %v2985_v28 = vpop.eup %2984  ;;  %3004 = vpow2.f32 %v2737_v21  ;;  %v3862_v45 = vmul.f32 -1.442695, %v3838_v25  ;;  %v3876_v63 = vmul.f32 -1.442695, %v3841_v26 }
 0x130   : > { %v2987_v41 = vpop.eup %2986  ;;  %v1444_v42 = vadd.f32 1.0, %v2985_v28  ;;  %3006 = vpow2.f32 %v2739_v22  ;;  %v893_v46 = vpop.f32.mrb[8].mxu0 }
 0x131   : > { %v966_v49 = vpop.f32.mrb[8].mxu1  ;;  %v2989_v51 = vpop.eup %2988  ;;  %v1446_v52 = vadd.f32 1.0, %v2987_v41  ;;  %3008 = vpow2.f32 %v2746_v24  ;;  %v3870_v55 = vadd.f32 %v893_v46, %v3762_v37 }
 0x132   : > { %v3873_v56 = vadd.f32 %v966_v49, %v3767_v38  ;;  %v895_v57 = vpop.f32.mrb[9].mxu0  ;;  %v968_v58 = vpop.f32.mrb[9].mxu1  ;;  %3010 = vrcp.f32 %v1444_v42  ;;  %v1445_v62 = vadd.f32 1.0, %v2989_v51 }
 0x133   : > { %4810 = vst [vmem:[#allocation6_spill] sm:$0xff] %v3870_v55  ;;  %v2991_v61 = vpop.eup %2990  ;;  %v3879_v35 = vadd.f32 %v895_v57, %v3771_v39  ;;  %v897_v0 = vpop.f32.mrb[10].mxu0  ;;  %3012 = vrcp.f32 %v1446_v52  ;;  %v3882_v8 = vmul.f32 -1.442695, %v3870_v55  ;;  %v3885_v13 = vadd.f32 %v968_v58, %v3776_v40 }
 0x134   : > { %4811 = vst [vmem:[#allocation7_spill] sm:$0xff] %v3873_v56  ;;  %v970_v1 = vpop.f32.mrb[10].mxu1  ;;  %v2993_v2 = vpop.eup %2992  ;;  %v1447_v7 = vadd.f32 1.0, %v2991_v61  ;;  %3014 = vrcp.f32 %v1445_v62  ;;  %v3888_v19 = vmul.f32 -1.442695, %v3873_v56  ;;  %v3894_v28 = vadd.f32 %v897_v0, %v3762_v37 }
 0x135   : > { %4812 = vst [vmem:[#allocation8_spill] sm:$0xff] %v3879_v35  ;;  %4813 = vst [vmem:[#allocation9_spill] sm:$0xff] %v3885_v13  ;;  %v899_v14 = vpop.f32.mrb[11].mxu0  ;;  %v2995_v16 = vpop.eup %2994  ;;  %v1454_v17 = vadd.f32 1.0, %v2993_v2  ;;  %v3891_v20 = vmul.f32 -1.442695, %v3879_v35  ;;  %v3897_v41 = vadd.f32 %v970_v1, %v3767_v38 }
 0x136   : > { %v972_v21 = vpop.f32.mrb[11].mxu1  ;;  %v2997_v22 = vpop.eup %2996  ;;  %3016 = vrcp.f32 %v1447_v7  ;;  %v1456_v24 = vadd.f32 1.0, %v2995_v16  ;;  %4814 = vst [vmem:[#allocation10_spill] sm:$0xff] %v3894_v28  ;;  %v3900_v49 = vadd.f32 %v899_v14, %v3771_v39  ;;  %v3906_v58 = vmul.f32 -1.442695, %v3885_v13 }
 0x137   : > { %4815 = vst [vmem:[#allocation11_spill] sm:$0xff] %v3897_v41  ;;  %v2999_v42 = vpop.eup %2998  ;;  %3018 = vrcp.f32 %v1454_v17  ;;  %v1455_v46 = vadd.f32 1.0, %v2997_v22  ;;  %v3903_v51 = vadd.f32 %v972_v21, %v3776_v40  ;;  %v3909_v61 = vmul.f32 -1.442695, %v3894_v28 }
 0x138   : > { %4816 = vst [vmem:[#allocation12_spill] sm:$0xff] %v3900_v49  ;;  %v3001_v52 = vpop.eup %3000  ;;  %3020 = vrcp.f32 %v1456_v24  ;;  %v1457_v57 = vadd.f32 1.0, %v2999_v42  ;;  %v3912_v1 = vmul.f32 -1.442695, %v3897_v41  ;;  %v3915_v2 = vmul.f32 -1.442695, %v3900_v49 }
 0x139   : > { %4817 = vst [vmem:[#allocation13_spill] sm:$0xff] %v3903_v51  ;;  %v3003_v62 = vpop.eup %3002  ;;  %3022 = vrcp.f32 %v1455_v46  ;;  %v1464_v0 = vadd.f32 1.0, %v3001_v52  ;;  %v903_v7 = vpop.f32.mrb[12].mxu0  ;;  %v3918_v17 = vmul.f32 -1.442695, %v3903_v51 }
 0x13a   : > { %v3005_v14 = vpop.eup %3004  ;;  %3024 = vrcp.f32 %v1457_v57  ;;  %v1466_v16 = vadd.f32 1.0, %v3003_v62  ;;  %v3921_v21 = vadd.f32 %v903_v7, %v3762_v37  ;;  %v976_v22 = vpop.f32.mrb[12].mxu1 }
 0x13b   : > { %v905_v24 = vpop.f32.mrb[13].mxu0  ;;  %v3007_v42 = vpop.eup %3006  ;;  %3026 = vrcp.f32 %v1464_v0  ;;  %v1465_v46 = vadd.f32 1.0, %v3005_v14  ;;  %v3924_v52 = vadd.f32 %v976_v22, %v3767_v38 }
 0x13c   : > { %4818 = vst [vmem:[#allocation14_spill] sm:$0xff] %v3921_v21  ;;  %v3927_v15 = vadd.f32 %v905_v24, %v3771_v39  ;;  %v978_v4 = vpop.f32.mrb[13].mxu1  ;;  %v907_v57 = vpop.f32.mrb[14].mxu0  ;;  %3028 = vrcp.f32 %v1466_v16  ;;  %v1467_v9 = vadd.f32 1.0, %v3007_v42  ;;  %v3930_v3 = vmul.f32 -1.442695, %v3921_v21 }
 0x13d   : > { %4819 = vst [vmem:[#allocation15_spill] sm:$0xff] %v3924_v52  ;;  %v3009_v62 = vpop.eup %3008  ;;  %v3933_v7 = vadd.f32 %v978_v4, %v3776_v40  ;;  %v980_v11 = vpop.f32.mrb[14].mxu1  ;;  %3030 = vrcp.f32 %v1465_v46  ;;  %v3936_v34 = vmul.f32 -1.442695, %v3924_v52  ;;  %v3948_v36 = vadd.f32 %v907_v57, %v3762_v37 }
 0x13e   : > { %4820 = vst [vmem:[#allocation16_spill] sm:$0xff] %v3927_v15  ;;  %v909_v0 = vpop.f32.mrb[15].mxu0  ;;  %v3011_v14 = vpop.eup %3010  ;;  %v1474_v22 = vadd.f32 1.0, %v3009_v62  ;;  %v3939_v24 = vmul.f32 -1.442695, %v3927_v15  ;;  %3032 = vrcp.f32 %v1467_v9  ;;  %v3952_v33 = vadd.f32 %v980_v11, %v3767_v38 }
 0x13f   : > { %4821 = vst [vmem:[#allocation17_spill] sm:$0xff] %v3933_v7  ;;  %v3941_v32 = vpop.f32.mrb[15].mxu1  ;;  %v3013_v16 = vpop.eup %3012  ;;  %v1684_v42 = vmul.f32 %v3011_v14, %v3779_v43  ;;  %v3945_v4 = vmul.f32 -1.442695, %v3933_v7  ;;  %4824 = vst [vmem:[#allocation20_spill] sm:$0xff] %v3948_v36  ;;  %v3955_v15 = vadd.f32 %v909_v0, %v3771_v39 }
 0x140   : > { %4822 = vst [vmem:[#allocation18_spill] sm:$0xff] %v3939_v24  ;;  %v3015_v46 = vpop.eup %3014  ;;  %v1686_v62 = vmul.f32 %v3013_v16, %v3782_v44  ;;  %3034 = vrcp.f32 %v1474_v22  ;;  %4825 = vst [vmem:[#allocation21_spill] sm:$0xff] %v3952_v33  ;;  %v3960_v9 = vmul.f32 -1.442695, %v3948_v36  ;;  %v3965_v11 = vmul.f32 -1.442695, %v3952_v33 }
 0x141   : > { %4823 = vst [vmem:[#allocation19_spill] sm:$0xff] %v3945_v4  ;;  %v3017_v52 = vpop.eup %3016  ;;  %v1774_v21 = vrot.slane %v1684_v42, 4  ;;  %v1685_v43 = vmul.f32 %v3015_v46, %v3785_v47  ;;  %3036 = vpow2.f32 %v3849_v29  ;;  %v3967_v38 = vpop.f32.mrb[16].mxu0 }
 0x142   : > { %4826 = vst [vmem:[#allocation22_spill] sm:$0xff] %v3960_v9  ;;  %v3019_v37 = vpop.eup %3018  ;;  %v1786_v57 = vrot.slane %v1686_v62, 4  ;;  %v1687_v44 = vmul.f32 %v3017_v52, %v3788_v48  ;;  %3038 = vpow2.f32 %v3862_v45  ;;  %4827 = vst [vmem:[#allocation23_spill] sm:$0xff] %v3965_v11  ;;  %v3969_v39 = vpop.f32.mrb[16].mxu1 }
 0x143   : > { %v3021_v0 = vpop.eup %3020  ;;  %v1775_v47 = vadd.f32 %v1774_v21, %v1684_v42  ;;  %v1780_v14 = vrot.slane %v1685_v43, 4  ;;  %v1694_v29 = vmul.f32 %v3019_v37, %v3793_v53  ;;  %3040 = vpow2.f32 %v3876_v63  ;;  %v3973_v22 = vpop.f32.mrb[17].mxu0 }
 0x144   : > { %v3975_v16 = vpop.f32.mrb[17].mxu1  ;;  %v3023_v48 = vpop.eup %3022  ;;  %v1787_v45 = vadd.f32 %v1786_v57, %v1686_v62  ;;  %v1792_v52 = vrot.slane %v1687_v44, 4  ;;  %v1696_v46 = vmul.f32 %v3021_v0, %v3796_v54  ;;  %3042 = vpow2.f32 %v3882_v8 }
 0x145   : > { %v3979_v33 = vpop.f32.mrb[18].mxu0  ;;  %v3981_v36 = vpop.f32.mrb[18].mxu1  ;;  %v1776_v42 = vrot.slane %v1775_v47, 2  ;;  %v1781_v53 = vadd.f32 %v1780_v14, %v1685_v43  ;;  %v1834_v37 = vrot.slane %v1694_v29, 4  ;;  %v1695_v63 = vmul.f32 %v3023_v48, %v3801_v59 }
 0x146   : > { %4828 = vst [vmem:[#allocation24_spill] sm:$0xff] %v3981_v36  ;;  %v3025_v21 = vpop.eup %3024  ;;  %v3984_v7 = vpop.f32.mrb[19].mxu0  ;;  %v1788_v57 = vrot.slane %v1787_v45, 2  ;;  %v1793_v49 = vadd.f32 %v1792_v52, %v1687_v44  ;;  %v1846_v54 = vrot.slane %v1696_v46, 4 }
 0x147   : > { %4829 = vst [vmem:[#allocation25_spill] sm:$0xff] %v3984_v7  ;;  %v3986_v51 = vpop.f32.mrb[19].mxu1  ;;  %v3027_v62 = vpop.eup %3026  ;;  %v1697_v8 = vmul.f32 %v3025_v21, %v3804_v60  ;;  %v1777_v41 = vadd.f32 %v1776_v42, %v1775_v47  ;;  %v1782_v28 = vrot.slane %v1781_v53, 2  ;;  %v1835_v11 = vadd.f32 %v1834_v37, %v1694_v29 }
 0x148   : > { %4830 = vst [vmem:[#allocation26_spill] sm:$0xff] %v3986_v51  ;;  %v3029_v0 = vpop.eup %3028  ;;  %v1840_v13 = vrot.slane %v1695_v63, 4  ;;  %v1789_v14 = vadd.f32 %v1788_v57, %v1787_v45  ;;  %v1794_v35 = vrot.slane %v1793_v49, 2  ;;  %v1847_v59 = vadd.f32 %v1846_v54, %v1696_v46  ;;  %v3989_v21 = vpop.f32.mrb[20].mxu0 }
 0x149   : > { %v3031_v43 = vpop.eup %3030  ;;  %v1852_v48 = vrot.slane %v1697_v8, 4  ;;  %v1778_v9 = vrot.slane %v1777_v41, 1  ;;  %v1783_v51 = vadd.f32 %v1782_v28, %v1781_v53  ;;  %v1836_v55 = vrot.slane %v1835_v11, 2  ;;  %4831 = vst [vmem:[#allocation27_spill] sm:$0xff] %v3989_v21  ;;  %v3991_v47 = vpop.f32.mrb[20].mxu1 }
 0x14a   : > { %v3033_v56 = vpop.eup %3032  ;;  %v1841_v7 = vadd.f32 %v1840_v13, %v1695_v63  ;;  %v1790_v52 = vrot.slane %v1789_v14, 1  ;;  %v1795_v4 = vadd.f32 %v1794_v35, %v1793_v49  ;;  %v1848_v36 = vrot.slane %v1847_v59, 2  ;;  %4832 = vst [vmem:[#allocation28_spill] sm:$0xff] %v3991_v47  ;;  %v3993_v57 = vpop.f32.mrb[21].mxu0 }
 0x14b   : > { %v3035_v44 = vpop.eup %3034  ;;  %v1853_v60 = vadd.f32 %v1852_v48, %v1697_v8  ;;  %v1779_v42 = vadd.f32 %v1778_v9, %v1777_v41  ;;  %v1784_v45 = vrot.slane %v1783_v51, 1  ;;  %v1837_v37 = vadd.f32 %v1836_v55, %v1835_v11  ;;  %4833 = vst [vmem:[#allocation29_spill] sm:$0xff] %v3993_v57  ;;  %v3995_v54 = vpop.f32.mrb[21].mxu1 }
 0x14c   : > { %v3037_v29 = vpop.eup %3036  ;;  %v1842_v46 = vrot.slane %v1841_v7, 2  ;;  %4834 = vst [vmem:[#allocation30_spill] sm:$0xff] %v3995_v54  ;;  %v1791_v13 = vadd.f32 %v1790_v52, %v1789_v14  ;;  %v1796_v53 = vrot.slane %v1795_v4, 1  ;;  %v1849_v63 = vadd.f32 %v1848_v36, %v1847_v59  ;;  %v3997_v49 = vpop.f32.mrb[22].mxu0 }
 0x14d   : > { %v3039_v28 = vpop.eup %3038  ;;  %v1854_v35 = vrot.slane %v1853_v60, 2  ;;  %4835 = vst [vmem:[#allocation31_spill] sm:$0xff] %v3997_v49  ;;  %v3999_v8 = vpop.f32.mrb[22].mxu1  ;;  %v1785_v47 = vadd.f32 %v1784_v45, %v1783_v51  ;;  %v1838_v21 = vrot.slane %v1837_v37, 1  ;;  %v1704_v55 = vmul.f32 %v3027_v62, %v3813_v5 }
 0x14e   : > { %4836 = vst [vmem:[#allocation32_spill] sm:$0xff] %v3999_v8  ;;  %v3041_v48 = vpop.eup %3040  ;;  %v1843_v41 = vadd.f32 %v1842_v46, %v1841_v7  ;;  %v4002_v9 = vpop.f32.mrb[23].mxu0  ;;  %v1797_v57 = vadd.f32 %v1796_v53, %v1795_v4  ;;  %v1850_v14 = vrot.slane %v1849_v63, 1  ;;  %v1706_v36 = vmul.f32 %v3029_v0, %v3816_v6 }
 0x14f   : > { %v4004_v11 = vpop.f32.mrb[23].mxu1  ;;  %v3043_v54 = vpop.eup %3042  ;;  %v1855_v52 = vadd.f32 %v1854_v35, %v1853_v60  ;;  %v1839_v59 = vadd.f32 %v1838_v21, %v1837_v37  ;;  %v1894_v24 = vrot.slane %v1704_v55, 4  ;;  %v1705_v8 = vmul.f32 %v3031_v43, %v3820_v10 }
 0x150   : > { %4837 = vst [vmem:[#allocation33_spill] sm:$0xff] %v4004_v11  ;;  %v1844_v49 = vrot.slane %v1843_v41, 1  ;;  %v1851_v51 = vadd.f32 %v1850_v14, %v1849_v63  ;;  %v1906_v7 = vrot.slane %v1706_v36, 4  ;;  %v1707_v5 = vmul.f32 %v3033_v56, %v3823_v12  ;;  %v4011_v21 = vpop.f32.mrb[24].mxu0  ;;  %v4013_v37 = vpop.f32.mrb[24].mxu1 }
 0x151   : > { %v1856_v45 = vrot.slane %v1855_v52, 1  ;;  %v2335_v62 = vsel %vm2334_vm0, %v1839_v59, %v1779_v42  ;;  %v1895_v11 = vadd.f32 %v1894_v24, %v1704_v55  ;;  %v1900_v4 = vrot.slane %v1705_v8, 4  ;;  %v4017_v56 = vpop.f32.mrb[25].mxu0  ;;  %v4019_v42 = vpop.f32.mrb[25].mxu1 }
 0x152   : > { %v1845_v46 = vadd.f32 %v1844_v49, %v1843_v41  ;;  %v2355_v60 = vsel %vm2334_vm0, %v1851_v51, %v1791_v13  ;;  %v1907_v6 = vadd.f32 %v1906_v7, %v1706_v36  ;;  %v1912_v0 = vrot.slane %v1707_v5, 4  ;;  %v4022_v41 = vpop.f32.mrb[26].mxu0  ;;  %v4024_v55 = vpop.f32.mrb[26].mxu1 }
 0x153   : > { %v1857_v53 = vadd.f32 %v1856_v45, %v1855_v52  ;;  %v1896_v43 = vrot.slane %v1895_v11, 2  ;;  %v1901_v63 = vadd.f32 %v1900_v4, %v1705_v8  ;;  %v1714_v12 = vmul.f32 %v3035_v44, %v3829_v18  ;;  %4838 = vst [vmem:[#allocation34_spill] sm:$0xff] %v4022_v41  ;;  %4839 = vst [vmem:[#allocation35_spill] sm:$0xff] %v4024_v55  ;;  %v4026_v8 = vpop.f32.mrb[27].mxu0  ;;  %v4028_v18 = vpop.f32.mrb[27].mxu1  ;;  %v4890_v41 = vld [vmem:[#allocation15_spill] sm:$0xff] }
 0x154   : > { %v2348_v10 = vsel %vm2334_vm0, %v1845_v46, %v1785_v47  ;;  %v1908_v13 = vrot.slane %v1907_v6, 2  ;;  %v1913_v35 = vadd.f32 %v1912_v0, %v1707_v5  ;;  %v1476_v49 = vadd.f32 1.0, %v3037_v29  ;;  %4840 = vst [vmem:[#allocation36_spill] sm:$0xff] %v4026_v8  ;;  %4841 = vst [vmem:[#allocation37_spill] sm:$0xff] %v4028_v18  ;;  %v4884_v8 = vld [vmem:[#allocation13_spill] sm:$0xff] }
 0x155   : > { %v2362_v24 = vsel %vm2334_vm0, %v1857_v53, %v1797_v57  ;;  %v1897_v14 = vadd.f32 %v1896_v43, %v1895_v11  ;;  %v1902_v52 = vrot.slane %v1901_v63, 2  ;;  %v1954_v47 = vrot.slane %v1714_v12, 4 }
 0x156   : > { %v1475_v36 = vadd.f32 1.0, %v3039_v28  ;;  %v1909_v44 = vadd.f32 %v1908_v13, %v1907_v6  ;;  %v1914_v59 = vrot.slane %v1913_v35, 2  ;;  %3044 = vrcp.f32 %v1476_v49 }
 0x157   : > { %v1477_v57 = vadd.f32 1.0, %v3041_v48  ;;  %v1898_v51 = vrot.slane %v1897_v14, 1  ;;  %v1903_v45 = vadd.f32 %v1902_v52, %v1901_v63  ;;  %v1955_v29 = vadd.f32 %v1954_v47, %v1714_v12 }
 0x158   : > { %3046 = vrcp.f32 %v1475_v36  ;;  %v1910_v7 = vrot.slane %v1909_v44, 1  ;;  %v1915_v5 = vadd.f32 %v1914_v59, %v1913_v35  ;;  %v1484_v11 = vadd.f32 1.0, %v3043_v54  ;;  %v4034_v48 = vpop.f32.mrb[28].mxu0  ;;  %v4036_v43 = vpop.f32.mrb[28].mxu1 }
 0x159   : > { %3048 = vrcp.f32 %v1477_v57  ;;  %v1899_v46 = vadd.f32 %v1898_v51, %v1897_v14  ;;  %v1904_v4 = vrot.slane %v1903_v45, 1  ;;  %v1956_v28 = vrot.slane %v1955_v29, 2  ;;  %4842 = vst [vmem:[#allocation38_spill] sm:$0xff] %v4034_v48  ;;  %4843 = vst [vmem:[#allocation39_spill] sm:$0xff] %v4036_v43  ;;  %v4040_v54 = vpop.f32.mrb[29].mxu0  ;;  %v4042_v35 = vpop.f32.mrb[29].mxu1 }
 0x15a   : > { %3050 = vpow2.f32 %v3888_v19  ;;  %v1911_v53 = vadd.f32 %v1910_v7, %v1909_v44  ;;  %v1916_v0 = vrot.slane %v1915_v5, 1  ;;  %v4032_v6 = vmul.f32 -1.442695, %v3955_v15  ;;  %4844 = vst [vmem:[#allocation40_spill] sm:$0xff] %v4040_v54  ;;  %4845 = vst [vmem:[#allocation41_spill] sm:$0xff] %v4042_v35  ;;  %v4052_v52 = vpop.f32.mrb[30].mxu0 }
 0x15b   : > { %3052 = vrcp.f32 %v1484_v11  ;;  %v2337_v63 = vsel %vm2336_vm1, %v1899_v46, %v2335_v62  ;;  %v1905_v12 = vadd.f32 %v1904_v4, %v1903_v45  ;;  %v1957_v13 = vadd.f32 %v1956_v28, %v1955_v29  ;;  %4846 = vst [vmem:[#allocation42_spill] sm:$0xff] %v4052_v52  ;;  %v4054_v62 = vpop.f32.mrb[30].mxu1  ;;  %v4064_v36 = vpop.f32.mrb[31].mxu0  ;;  %v4854_v11 = vld [vmem:[#allocation18_spill] sm:$0xff] }
 0x15c   : > { %3054 = vpow2.f32 %v3891_v20  ;;  %v4045_v19 = vsel %vm2336_vm1, %v1911_v53, %v2355_v60  ;;  %v1917_v49 = vadd.f32 %v1916_v0, %v1915_v5  ;;  %v4050_v14 = vadd.f32 %v3941_v32, %v3776_v40  ;;  %4847 = vst [vmem:[#allocation43_spill] sm:$0xff] %v4054_v62  ;;  %4848 = vst [vmem:[#allocation44_spill] sm:$0xff] %v4064_v36  ;;  %v4858_v0 = vld [vmem:[#allocation19_spill] sm:$0xff]  ;;  %v4863_v54 = vld [vmem:[#allocation26_spill] sm:$0xff] }
 0x15d   : > { %3056 = vpow2.f32 %v3906_v58  ;;  %v4057_v20 = vsel %vm2336_vm1, %v1905_v12, %v2348_v10  ;;  %v1958_v47 = vrot.slane %v1957_v13, 1  ;;  %v4062_v60 = vadd.f32 %v3967_v38, %v3846_v27  ;;  %v4066_v58 = vpop.f32.mrb[31].mxu1 }
 0x15e   : > { %3058 = vpow2.f32 %v3909_v61  ;;  %4849 = vst [vmem:[#allocation45_spill] sm:$0xff] %v4066_v58  ;;  %v4069_v32 = vsel %vm2336_vm1, %v1917_v49, %v2362_v24  ;;  %v4073_v40 = vmul.f32 -1.442695, %v4050_v14  ;;  %v4077_v10 = vadd.f32 %v3969_v39, %v3854_v30 }
 0x15f   : > { %3060 = vpow2.f32 %v3912_v1  ;;  %v1959_v61 = vadd.f32 %v1958_v47, %v1957_v13  ;;  %v4081_v38 = vmul.f32 -1.442695, %v4062_v60  ;;  %v4085_v44 = vadd.f32 %v3973_v22, %v3859_v31  ;;  %v4861_v47 = vld [vmem:[#allocation6_spill] sm:$0xff] }
 0x160   : > { %3062 = vpow2.f32 %v3915_v2  ;;  %v3045_v24 = vpop.eup %3044  ;;  %v4089_v1 = vmul.f32 -1.442695, %v4077_v10  ;;  %v4093_v39 = vadd.f32 %v3975_v16, %v3867_v50  ;;  %v4097_v2 = vadd.f32 %v3979_v33, %v3846_v27  ;;  %v4115_v29 = vpop.f32.mrb[32].mxu0 }
 0x161   : > { %3064 = vpow2.f32 %v3918_v17  ;;  %v4100_v57 = vsel %vm2338_vm2, %v1959_v61, %v2337_v63  ;;  %v1716_v22 = vmul.f32 %v3045_v24, %v3834_v23  ;;  %v4105_v17 = vmul.f32 -1.442695, %v4085_v44  ;;  %4852 = vst [vmem:[#allocation48_spill] sm:$0xff] %v4115_v29  ;;  %v4117_v7 = vpop.f32.mrb[32].mxu1  ;;  %v4859_v63 = vld [vmem:[#allocation25_spill] sm:$0xff]  ;;  %v4862_v24 = vld [vmem:[#allocation22_spill] sm:$0xff] }
 0x162   : > { %4850 = vst [vmem:[#allocation46_spill] sm:$0xff] %v4093_v39  ;;  %4851 = vst [vmem:[#allocation47_spill] sm:$0xff] %v4097_v2  ;;  %v3047_v59 = vpop.eup %3046  ;;  %3066 = vpow2.f32 %v3930_v3  ;;  %v4110_v16 = vmul.f32 -1.442695, %v4093_v39  ;;  %v4113_v33 = vmul.f32 -1.442695, %v4097_v2  ;;  %v4130_v12 = vadd.f32 %v4859_v63, %v3859_v31 }
 0x163   : > { %v3049_v51 = vpop.eup %3048  ;;  %v1715_v45 = vmul.f32 %v3047_v59, %v3838_v25  ;;  %3068 = vpow2.f32 %v3936_v34  ;;  %4853 = vst [vmem:[#allocation49_spill] sm:$0xff] %v4117_v7  ;;  %v1966_v3 = vrot.slane %v1716_v22, 4  ;;  %v4855_v25 = vld [vmem:[#allocation24_spill] sm:$0xff]  ;;  %v4125_v34 = vpop.f32.mrb[33].mxu0 }
 0x164   : > { %v3051_v23 = vpop.eup %3050  ;;  %v1717_v5 = vmul.f32 %v3049_v51, %v3841_v26  ;;  %3070 = vpow2.f32 %v4854_v11  ;;  %v4123_v46 = vadd.f32 %v4855_v25, %v3854_v30  ;;  %4857 = vst [vmem:[#allocation24_spill] sm:$0xff] %v4125_v34  ;;  %4860 = vst [vmem:[#allocation19_spill] sm:$0xff] %v4130_v12 }
 0x165   : > { %v3053_v4 = vpop.eup %3052  ;;  %v1960_v28 = vrot.slane %v1715_v45, 4  ;;  %v1486_v53 = vadd.f32 1.0, %v3051_v23  ;;  %3072 = vpow2.f32 %v4858_v0  ;;  %v1967_v49 = vadd.f32 %v1966_v3, %v1716_v22 }
 0x166   : > { %4856 = vst [vmem:[#allocation18_spill] sm:$0xff] %v4123_v46  ;;  %v3055_v13 = vpop.eup %3054  ;;  %v1972_v26 = vrot.slane %v1717_v5, 4  ;;  %v1724_v61 = vmul.f32 %v3053_v4, %v4861_v47  ;;  %3074 = vpow2.f32 %v4862_v24  ;;  %v4135_v25 = vmul.f32 -1.442695, %v4123_v46 }
 0x167   : > { %v3057_v59 = vpop.eup %3056  ;;  %v1961_v51 = vadd.f32 %v1960_v28, %v1715_v45  ;;  %3076 = vrcp.f32 %v1486_v53  ;;  %v1485_v11 = vadd.f32 1.0, %v3055_v13  ;;  %v1968_v0 = vrot.slane %v1967_v49, 2 }
 0x168   : > { %v3059_v23 = vpop.eup %3058  ;;  %v1973_v7 = vadd.f32 %v1972_v26, %v1717_v5  ;;  %v2014_v34 = vrot.slane %v1724_v61, 4  ;;  %v1487_v63 = vadd.f32 1.0, %v3057_v59  ;;  %v4138_v3 = vmul.f32 -1.442695, %v4130_v12 }
 0x169   : > { %v3061_v29 = vpop.eup %3060  ;;  %v1962_v58 = vrot.slane %v1961_v51, 2  ;;  %3078 = vrcp.f32 %v1485_v11  ;;  %v1494_v22 = vadd.f32 1.0, %v3059_v23  ;;  %v1969_v45 = vadd.f32 %v1968_v0, %v1967_v49 }
 0x16a   : > { %v3063_v4 = vpop.eup %3062  ;;  %v1974_v28 = vrot.slane %v1973_v7, 2  ;;  %v2015_v53 = vadd.f32 %v2014_v34, %v1724_v61  ;;  %3080 = vrcp.f32 %v1487_v63  ;;  %v1496_v24 = vadd.f32 1.0, %v3061_v29  ;;  %v4144_v29 = vpop.f32.mrb[33].mxu1 }
 0x16b   : > { %v3065_v13 = vpop.eup %3064  ;;  %v1963_v47 = vadd.f32 %v1962_v58, %v1961_v51  ;;  %3082 = vrcp.f32 %v1494_v22  ;;  %v1495_v5 = vadd.f32 1.0, %v3063_v4  ;;  %v1970_v59 = vrot.slane %v1969_v45, 1  ;;  %4865 = vst [vmem:[#allocation6_spill] sm:$0xff] %v4144_v29 }
 0x16c   : > { %v3067_v26 = vpop.eup %3066  ;;  %v1975_v36 = vadd.f32 %v1974_v28, %v1973_v7  ;;  %v2016_v62 = vrot.slane %v2015_v53, 2  ;;  %v1497_v52 = vadd.f32 1.0, %v3065_v13  ;;  %3084 = vrcp.f32 %v1496_v24  ;;  %v4150_v24 = vpop.f32.mrb[34].mxu0 }
 0x16d   : > { %v3069_v11 = vpop.eup %3068  ;;  %v1964_v23 = vrot.slane %v1963_v47, 1  ;;  %v1504_v35 = vadd.f32 1.0, %v3067_v26  ;;  %v4142_v49 = vadd.f32 %v4863_v54, %v3867_v50  ;;  %v1971_v61 = vadd.f32 %v1970_v59, %v1969_v45  ;;  %4866 = vst [vmem:[#allocation22_spill] sm:$0xff] %v4150_v24 }
 0x16e   : > { %v3071_v34 = vpop.eup %3070  ;;  %v1976_v0 = vrot.slane %v1975_v36, 1  ;;  %v2017_v58 = vadd.f32 %v2016_v62, %v2015_v53  ;;  %3086 = vrcp.f32 %v1495_v5  ;;  %v1506_v7 = vadd.f32 1.0, %v3069_v11 }
 0x16f   : > { %4864 = vst [vmem:[#allocation25_spill] sm:$0xff] %v4142_v49  ;;  %v3073_v51 = vpop.eup %3072  ;;  %v1965_v63 = vadd.f32 %v1964_v23, %v1963_v47  ;;  %3088 = vrcp.f32 %v1497_v52  ;;  %v1505_v22 = vadd.f32 1.0, %v3071_v34  ;;  %v4148_v28 = vsel %vm2338_vm2, %v1971_v61, %v4045_v19  ;;  %v4867_v19 = vld [vmem:[#allocation7_spill] sm:$0xff]  ;;  %v4871_v23 = vld [vmem:[#allocation28_spill] sm:$0xff] }
 0x170   : > { %v3075_v4 = vpop.eup %3074  ;;  %v1977_v13 = vadd.f32 %v1976_v0, %v1975_v36  ;;  %v2018_v54 = vrot.slane %v2017_v58, 1  ;;  %3090 = vrcp.f32 %v1504_v35  ;;  %v1507_v53 = vadd.f32 1.0, %v3073_v51  ;;  %v4161_v36 = vpop.f32.mrb[34].mxu1 }
 0x171   : > { %v3077_v45 = vpop.eup %3076  ;;  %v4154_v62 = vsel %vm2338_vm2, %v1965_v63, %v4057_v20  ;;  %3092 = vrcp.f32 %v1506_v7  ;;  %v1514_v52 = vadd.f32 1.0, %v3075_v4  ;;  %4868 = vst [vmem:[#allocation26_spill] sm:$0xff] %v4161_v36  ;;  %v4164_v59 = vmul.f32 -1.442695, %v4142_v49  ;;  %v4869_v20 = vld [vmem:[#allocation27_spill] sm:$0xff]  ;;  %v4874_v7 = vld [vmem:[#allocation9_spill] sm:$0xff] }
 0x172   : > { %v4158_v47 = vsel %vm2338_vm2, %v1977_v13, %v4069_v32  ;;  %v2019_v5 = vadd.f32 %v2018_v54, %v2017_v58  ;;  %v1726_v26 = vmul.f32 %v3077_v45, %v4867_v19  ;;  %3094 = vrcp.f32 %v1505_v22  ;;  %v4873_v58 = vld [vmem:[#allocation8_spill] sm:$0xff]  ;;  %v4875_v4 = vld [vmem:[#allocation23_spill] sm:$0xff]  ;;  %v4187_v45 = vpop.f32.mrb[35].mxu0 }
 0x173   : > { %v3079_v35 = vpop.eup %3078  ;;  %3096 = vrcp.f32 %v1507_v53  ;;  %v4168_v11 = vadd.f32 %v4869_v20, %v3846_v27  ;;  %v4172_v34 = vadd.f32 %v4871_v23, %v3854_v30  ;;  %4876 = vst [vmem:[#allocation28_spill] sm:$0xff] %v4187_v45  ;;  %v4879_v23 = vld [vmem:[#allocation29_spill] sm:$0xff]  ;;  %v4883_v45 = vld [vmem:[#allocation12_spill] sm:$0xff] }
 0x174   : > { %v3081_v32 = vpop.eup %3080  ;;  %v4176_v61 = vsel %vm2340_vm3, %v2019_v5, %v4100_v57  ;;  %v2026_v0 = vrot.slane %v1726_v26, 4  ;;  %v1725_v51 = vmul.f32 %v3079_v35, %v4873_v58  ;;  %3098 = vrcp.f32 %v1514_v52  ;;  %v4877_v5 = vld [vmem:[#allocation10_spill] sm:$0xff]  ;;  %v4191_v52 = vpop.f32.mrb[35].mxu1 }
 0x175   : > { %4870 = vst [vmem:[#allocation7_spill] sm:$0xff] %v4168_v11  ;;  %4872 = vst [vmem:[#allocation27_spill] sm:$0xff] %v4172_v34  ;;  %v3083_v63 = vpop.eup %3082  ;;  %v1727_v22 = vmul.f32 %v3081_v32, %v4874_v7  ;;  %3100 = vpow2.f32 %v4875_v4  ;;  %v4182_v13 = vmul.f32 -1.442695, %v4168_v11  ;;  %v4185_v54 = vmul.f32 -1.442695, %v4172_v34 }
 0x176   : > { %v2027_v53 = vadd.f32 %v2026_v0, %v1726_v26  ;;  %v2020_v57 = vrot.slane %v1725_v51, 4  ;;  %v1734_v19 = vmul.f32 %v3083_v63, %v4877_v5  ;;  %3102 = vpow2.f32 %v4032_v6  ;;  %4878 = vst [vmem:[#allocation8_spill] sm:$0xff] %v4191_v52  ;;  %v3085_v35 = vpop.eup %3084  ;;  %v4881_v58 = vld [vmem:[#allocation30_spill] sm:$0xff]  ;;  %v4882_v5 = vld [vmem:[#allocation11_spill] sm:$0xff]  ;;  %v4210_v11 = vpop.f32.mrb[36].mxu0 }
 0x177   : > { %v2032_v20 = vrot.slane %v1727_v22, 4  ;;  %3104 = vpow2.f32 %v4073_v40  ;;  %v4196_v32 = vadd.f32 %v4879_v23, %v3859_v31  ;;  %v4200_v7 = vadd.f32 %v4881_v58, %v3867_v50  ;;  %4886 = vst [vmem:[#allocation23_spill] sm:$0xff] %v4210_v11  ;;  %v4214_v12 = vpop.f32.mrb[37].mxu0 }
 0x178   : > { %v3087_v26 = vpop.eup %3086  ;;  %v2028_v0 = vrot.slane %v2027_v53, 2  ;;  %v2021_v4 = vadd.f32 %v2020_v57, %v1725_v51  ;;  %v2074_v63 = vrot.slane %v1734_v19, 4  ;;  %v1736_v6 = vmul.f32 %v3085_v35, %v4882_v5  ;;  %v4885_v5 = vld [vmem:[#allocation14_spill] sm:$0xff]  ;;  %4888 = vst [vmem:[#allocation29_spill] sm:$0xff] %v4214_v12 }
 0x179   : > { %4880 = vst [vmem:[#allocation9_spill] sm:$0xff] %v4196_v32  ;;  %v3089_v29 = vpop.eup %3088  ;;  %v2033_v52 = vadd.f32 %v2032_v20, %v1727_v22  ;;  %v1735_v36 = vmul.f32 %v3087_v26, %v4883_v45  ;;  %3106 = vpow2.f32 %v4081_v38  ;;  %v4206_v40 = vmul.f32 -1.442695, %v4196_v32  ;;  %v4212_v32 = vpop.f32.mrb[36].mxu1 }
 0x17a   : > { %v3091_v23 = vpop.eup %3090  ;;  %v2029_v24 = vadd.f32 %v2028_v0, %v2027_v53  ;;  %v2022_v58 = vrot.slane %v2021_v4, 2  ;;  %v2075_v43 = vadd.f32 %v2074_v63, %v1734_v19  ;;  %v2086_v48 = vrot.slane %v1736_v6, 4  ;;  %4887 = vst [vmem:[#allocation10_spill] sm:$0xff] %v4212_v32  ;;  %v4216_v46 = vpop.f32.mrb[37].mxu1 }
 0x17b   : > { %v3093_v18 = vpop.eup %3092  ;;  %v2034_v51 = vrot.slane %v2033_v52, 2  ;;  %v2080_v57 = vrot.slane %v1735_v36, 4  ;;  %v1737_v35 = vmul.f32 %v3089_v29, %v4884_v8  ;;  %v1744_v22 = vmul.f32 %v3091_v23, %v4885_v5  ;;  %4889 = vst [vmem:[#allocation30_spill] sm:$0xff] %v4216_v46 }
 0x17c   : > { %v3095_v20 = vpop.eup %3094  ;;  %v2030_v34 = vrot.slane %v2029_v24, 1  ;;  %v2023_v45 = vadd.f32 %v2022_v58, %v2021_v4  ;;  %v2076_v26 = vrot.slane %v2075_v43, 2  ;;  %v2087_v38 = vadd.f32 %v2086_v48, %v1736_v6 }
 0x17d   : > { %v3097_v53 = vpop.eup %3096  ;;  %v2035_v0 = vadd.f32 %v2034_v51, %v2033_v52  ;;  %v2081_v19 = vadd.f32 %v2080_v57, %v1735_v36  ;;  %v2092_v63 = vrot.slane %v1737_v35, 4  ;;  %v2134_v49 = vrot.slane %v1744_v22, 4 }
 0x17e   : > { %v3099_v8 = vpop.eup %3098  ;;  %v2031_v29 = vadd.f32 %v2030_v34, %v2029_v24  ;;  %v2024_v23 = vrot.slane %v2023_v45, 1  ;;  %v2077_v5 = vadd.f32 %v2076_v26, %v2075_v43  ;;  %v2088_v4 = vrot.slane %v2087_v38, 2 }
 0x17f   : > { %v3101_v48 = vpop.eup %3100  ;;  %v2036_v6 = vrot.slane %v2035_v0, 1  ;;  %v2082_v58 = vrot.slane %v2081_v19, 2  ;;  %v2093_v11 = vadd.f32 %v2092_v63, %v1737_v35  ;;  %v2135_v32 = vadd.f32 %v2134_v49, %v1744_v22 }
 0x180   : > { %v3103_v2 = vpop.eup %3102  ;;  %v2358_v36 = vsel %vm2340_vm3, %v2031_v29, %v4148_v28  ;;  %v2025_v52 = vadd.f32 %v2024_v23, %v2023_v45  ;;  %v2078_v51 = vrot.slane %v2077_v5, 1  ;;  %v2089_v57 = vadd.f32 %v2088_v4, %v2087_v38  ;;  %v4891_v29 = vld [vmem:[#allocation16_spill] sm:$0xff] }
 0x181   : > { %v3105_v12 = vpop.eup %3104  ;;  %v2037_v46 = vadd.f32 %v2036_v6, %v2035_v0  ;;  %v2083_v55 = vadd.f32 %v2082_v58, %v2081_v19  ;;  %v2094_v24 = vrot.slane %v2093_v11, 2  ;;  %v2136_v34 = vrot.slane %v2135_v32, 2  ;;  %v4892_v6 = vld [vmem:[#allocation17_spill] sm:$0xff] }
 0x182   : > { %v2351_v43 = vsel %vm2340_vm3, %v2025_v52, %v4154_v62  ;;  %v2079_v26 = vadd.f32 %v2078_v51, %v2077_v5  ;;  %v2090_v39 = vrot.slane %v2089_v57, 1  ;;  %v1746_v35 = vmul.f32 %v3093_v18, %v4890_v41 }
 0x183   : > { %v3107_v49 = vpop.eup %3106  ;;  %v2365_v22 = vsel %vm2340_vm3, %v2037_v46, %v4158_v47  ;;  %v2084_v28 = vrot.slane %v2083_v55, 1  ;;  %v2095_v45 = vadd.f32 %v2094_v24, %v2093_v11  ;;  %v2137_v63 = vadd.f32 %v2136_v34, %v2135_v32  ;;  %v4893_v46 = vld [vmem:[#allocation20_spill] sm:$0xff] }
 0x184   : > { %v2343_v38 = vsel %vm2342_vm4, %v2079_v26, %v4176_v61  ;;  %v2091_v0 = vadd.f32 %v2090_v39, %v2089_v57  ;;  %v2146_v19 = vrot.slane %v1746_v35, 4  ;;  %v1745_v23 = vmul.f32 %v3095_v20, %v4891_v29  ;;  %v4234_v26 = vpop.f32.mrb[38].mxu0  ;;  %v4894_v29 = vld [vmem:[#allocation31_spill] sm:$0xff] }
 0x185   : > { %v2085_v4 = vadd.f32 %v2084_v28, %v2083_v55  ;;  %v2096_v62 = vrot.slane %v2095_v45, 1  ;;  %v2138_v5 = vrot.slane %v2137_v63, 1  ;;  %v1747_v58 = vmul.f32 %v3097_v53, %v4892_v6 }
 0x186   : > { %v2359_v41 = vsel %vm2342_vm4, %v2091_v0, %v2358_v36  ;;  %v2147_v18 = vadd.f32 %v2146_v19, %v1746_v35  ;;  %v2140_v52 = vrot.slane %v1745_v23, 4  ;;  %v1754_v47 = vmul.f32 %v3099_v8, %v4893_v46  ;;  %v4254_v46 = vpop.f32.mrb[39].mxu0 }
 0x187   : > { %v2352_v11 = vsel %vm2342_vm4, %v2085_v4, %v2351_v43  ;;  %v2097_v32 = vadd.f32 %v2096_v62, %v2095_v45  ;;  %v2139_v51 = vadd.f32 %v2138_v5, %v2137_v63  ;;  %v2152_v61 = vrot.slane %v1747_v58, 4 }
 0x188   : > { %v2148_v39 = vrot.slane %v2147_v18, 2  ;;  %v2141_v57 = vadd.f32 %v2140_v52, %v1745_v23  ;;  %v2194_v24 = vrot.slane %v1754_v47, 4  ;;  %v1516_v20 = vadd.f32 1.0, %v3101_v48 }
 0x189   : > { %v2366_v55 = vsel %vm2342_vm4, %v2097_v32, %v2365_v22  ;;  %v2345_v34 = vsel %vm2344_vm5, %v2139_v51, %v2343_v38  ;;  %v2153_v53 = vadd.f32 %v2152_v61, %v1747_v58  ;;  %v1515_v36 = vadd.f32 1.0, %v3103_v2  ;;  %v4237_v22 = vpop.f32.mrb[38].mxu1 }
 0x18a   : > { %v2149_v35 = vadd.f32 %v2148_v39, %v2147_v18  ;;  %v2142_v8 = vrot.slane %v2141_v57, 2  ;;  %v2195_v28 = vadd.f32 %v2194_v24, %v1754_v47  ;;  %3108 = vrcp.f32 %v1516_v20  ;;  %v4256_v47 = vpop.f32.mrb[39].mxu1  ;;  %v4896_v39 = vld [vmem:[#allocation33_spill] sm:$0xff] }
 0x18b   : > { %v2154_v43 = vrot.slane %v2153_v53, 2  ;;  %3110 = vrcp.f32 %v1515_v36  ;;  %v1517_v45 = vadd.f32 1.0, %v3105_v12  ;;  %v1448_v63 = vadd.f32 1.0, %v3107_v49  ;;  %v4897_v36 = vld [vmem:[#allocation21_spill] sm:$0xff] }
 0x18c   : > { %v2150_v0 = vrot.slane %v2149_v35, 1  ;;  %v2143_v19 = vadd.f32 %v2142_v8, %v2141_v57  ;;  %v2196_v48 = vrot.slane %v2195_v28, 2  ;;  %3112 = vpow2.f32 %v4089_v1  ;;  %v4895_v1 = vld [vmem:[#allocation32_spill] sm:$0xff] }
 0x18d   : > { %v2155_v38 = vadd.f32 %v2154_v43, %v2153_v53  ;;  %3114 = vrcp.f32 %v1517_v45  ;;  %v2743_v2 = vmul.f32 -1.442695, %v4200_v7  ;;  %v4242_v23 = vadd.f32 %v4894_v29, %v3846_v27 }
 0x18e   : > { %v2151_v4 = vadd.f32 %v2150_v0, %v2149_v35  ;;  %v2144_v62 = vrot.slane %v2143_v19, 1  ;;  %v2197_v5 = vadd.f32 %v2196_v48, %v2195_v28  ;;  %3116 = vrcp.f32 %v1448_v63 }
 0x18f   : > { %v2156_v12 = vrot.slane %v2155_v38, 1  ;;  %3118 = vpow2.f32 %v4105_v17  ;;  %v2750_v49 = vmul.f32 -1.442695, %v4242_v23  ;;  %v4248_v6 = vadd.f32 %v4895_v1, %v3854_v30 }
 0x190   : > { %v4251_v58 = vsel %vm2344_vm5, %v2151_v4, %v2359_v41  ;;  %v2145_v18 = vadd.f32 %v2144_v62, %v2143_v19  ;;  %v2198_v52 = vrot.slane %v2197_v5, 1  ;;  %3120 = vpow2.f32 %v4110_v16  ;;  %v1764_v16 = vld [vmem:[%s4772_s3] sm:$0xff] }
 0x191   : > { %v2157_v32 = vadd.f32 %v2156_v12, %v2155_v38  ;;  %3122 = vpow2.f32 %v4113_v33  ;;  %v2752_v17 = vmul.f32 -1.442695, %v4248_v6  ;;  %v4262_v51 = vadd.f32 %v4002_v9, %v3859_v31 }
 0x192   : > { %v4265_v41 = vsel %vm2344_vm5, %v2145_v18, %v2352_v11  ;;  %v2199_v61 = vadd.f32 %v2198_v52, %v2197_v5  ;;  %3124 = vpow2.f32 %v4135_v25  ;;  %v4273_v57 = vadd.f32 %v4896_v39, %v3867_v50 }
 0x193   : > { %v4276_v33 = vsel %vm2344_vm5, %v2157_v32, %v2366_v55  ;;  %3126 = vpow2.f32 %v4138_v3  ;;  %v4280_v9 = vmul.f32 -1.442695, %v4262_v51  ;;  %v4284_v11 = vadd.f32 %v4011_v21, %v3846_v27 }
 0x194   : > { %v3109_v24 = vpop.eup %3108  ;;  %v2347_v20 = vsel %vm2346_vm6, %v2199_v61, %v2345_v34  ;;  %3128 = vpow2.f32 %v4164_v59  ;;  %v4289_v25 = vmul.f32 -1.442695, %v4273_v57  ;;  %v4293_v55 = vadd.f32 %v4013_v37, %v3854_v30 }
 0x195   : > { %v3111_v3 = vpop.eup %3110  ;;  %v2421_v53 = vadd.f32 %v2347_v20, %v1764_v16  ;;  %v1756_v35 = vmul.f32 %v3109_v24, %v4897_v36  ;;  %3130 = vpow2.f32 %v4182_v13  ;;  %v4298_v21 = vmul.f32 -1.442695, %v4284_v11 }
 0x196   : > { %v3113_v8 = vpop.eup %3112  ;;  %v1755_v34 = vmul.f32 %v3111_v3, %v3955_v15  ;;  %3132 = vpow2.f32 %v4185_v54  ;;  %v4303_v59 = vmul.f32 -1.442695, %v4293_v55  ;;  %v4307_v37 = vadd.f32 %v4017_v56, %v3859_v31 }
 0x197   : > { %v3115_v28 = vpop.eup %3114  ;;  %2431 = vst [vmem:[%s4772_s3] sm:$0xff] %v2421_v53  ;;  %v2206_v13 = vrot.slane %v1756_v35, 4  ;;  %v1450_v43 = vadd.f32 1.0, %v3113_v8  ;;  %3134 = vpow2.f32 %v4206_v40  ;;  %v4315_v15 = vadd.f32 %v4019_v42, %v3867_v50 }
 0x198   : > { %v3117_v54 = vpop.eup %3116  ;;  %v2200_v45 = vrot.slane %v1755_v34, 4  ;;  %v1757_v63 = vmul.f32 %v3115_v28, %v4050_v14  ;;  %3136 = vpow2.f32 %v2743_v2  ;;  %v4319_v56 = vmul.f32 -1.442695, %v4307_v37 }
 0x199   : > { %v3119_v0 = vpop.eup %3118  ;;  %v2207_v19 = vadd.f32 %v2206_v13, %v1756_v35  ;;  %v1688_v48 = vmul.f32 %v3117_v54, %v4062_v60  ;;  %3138 = vrcp.f32 %v1450_v43  ;;  %v4323_v38 = vmul.f32 -1.442695, %v4315_v15  ;;  %v1766_v43 = vld [vmem:[%s4772_s3 + $0x10] sm:$0xff] }
 0x19a   : > { %v3121_v40 = vpop.eup %3120  ;;  %v2201_v29 = vadd.f32 %v2200_v45, %v1755_v34  ;;  %v2212_v42 = vrot.slane %v1757_v63, 4  ;;  %v1449_v4 = vadd.f32 1.0, %v3119_v0  ;;  %3140 = vpow2.f32 %v2750_v49 }
 0x19b   : > { %v3123_v62 = vpop.eup %3122  ;;  %v2208_v5 = vrot.slane %v2207_v19, 2  ;;  %v1798_v14 = vrot.slane %v1688_v48, 4  ;;  %v1451_v2 = vadd.f32 1.0, %v3121_v40  ;;  %3142 = vpow2.f32 %v2752_v17 }
 0x19c   : > { %v3125_v12 = vpop.eup %3124  ;;  %v2202_v1 = vrot.slane %v2201_v29, 2  ;;  %v2213_v18 = vadd.f32 %v2212_v42, %v1757_v63  ;;  %3144 = vrcp.f32 %v1449_v4  ;;  %v1458_v52 = vadd.f32 1.0, %v3123_v62 }
 0x19d   : > { %v3127_v60 = vpop.eup %3126  ;;  %v2209_v32 = vadd.f32 %v2208_v5, %v2207_v19  ;;  %v1799_v16 = vadd.f32 %v1798_v14, %v1688_v48  ;;  %3146 = vrcp.f32 %v1451_v2  ;;  %v1460_v61 = vadd.f32 1.0, %v3125_v12  ;;  %v1765_v19 = vld [vmem:[%s4772_s3 + $0x8] sm:$0xff] }
 0x19e   : > { %v3129_v39 = vpop.eup %3128  ;;  %v2203_v24 = vadd.f32 %v2202_v1, %v2201_v29  ;;  %v2214_v20 = vrot.slane %v2213_v18, 2  ;;  %3148 = vrcp.f32 %v1458_v52  ;;  %v1459_v49 = vadd.f32 1.0, %v3127_v60  ;;  %v1767_v1 = vld [vmem:[%s4772_s3 + $0x18] sm:$0xff] }
 0x19f   : > { %v3131_v3 = vpop.eup %3130  ;;  %v2210_v53 = vrot.slane %v2209_v32, 1  ;;  %v1800_v36 = vrot.slane %v1799_v16, 2  ;;  %3150 = vrcp.f32 %v1460_v61  ;;  %v1461_v17 = vadd.f32 1.0, %v3129_v39 }
 0x1a0   : > { %v3133_v35 = vpop.eup %3132  ;;  %v2204_v8 = vrot.slane %v2203_v24, 1  ;;  %v2215_v34 = vadd.f32 %v2214_v20, %v2213_v18  ;;  %3152 = vrcp.f32 %v1459_v49  ;;  %v1468_v28 = vadd.f32 1.0, %v3131_v3  ;;  %v4898_v3 = vld [vmem:[#allocation34_spill] sm:$0xff] }
 0x1a1   : > { %v3135_v13 = vpop.eup %3134  ;;  %v2211_v54 = vadd.f32 %v2210_v53, %v2209_v32  ;;  %v1801_v45 = vadd.f32 %v1800_v36, %v1799_v16  ;;  %3154 = vrcp.f32 %v1461_v17  ;;  %v1470_v63 = vadd.f32 1.0, %v3133_v35  ;;  %v4899_v35 = vld [vmem:[#allocation46_spill] sm:$0xff] }
 0x1a2   : > { %v3137_v0 = vpop.eup %3136  ;;  %v2205_v48 = vadd.f32 %v2204_v8, %v2203_v24  ;;  %v2216_v40 = vrot.slane %v2215_v34, 1  ;;  %3156 = vrcp.f32 %v1468_v28  ;;  %v1469_v29 = vadd.f32 1.0, %v3135_v13  ;;  %v4900_v8 = vld [vmem:[#allocation35_spill] sm:$0xff] }
 0x1a3   : > { %v3139_v42 = vpop.eup %3138  ;;  %v2361_v4 = vsel %vm2346_vm6, %v2211_v54, %v4251_v58  ;;  %v1802_v62 = vrot.slane %v1801_v45, 1  ;;  %3158 = vrcp.f32 %v1470_v63  ;;  %v1471_v5 = vadd.f32 1.0, %v3137_v0  ;;  %v4901_v13 = vld [vmem:[#allocation47_spill] sm:$0xff] }
 0x1a4   : > { %v3141_v14 = vpop.eup %3140  ;;  %v2423_v2 = vadd.f32 %v2361_v4, %v1766_v43  ;;  %v2354_v12 = vsel %vm2346_vm6, %v2205_v48, %v4265_v41  ;;  %v2217_v18 = vadd.f32 %v2216_v40, %v2215_v34  ;;  %v1690_v52 = vmul.f32 %v3139_v42, %v4077_v10  ;;  %v4903_v4 = vld [vmem:[#allocation19_spill] sm:$0xff] }
 0x1a5   : > { %v3143_v60 = vpop.eup %3142  ;;  %v2422_v32 = vadd.f32 %v2354_v12, %v1765_v19  ;;  %v4339_v16 = vadd.f32 %v1802_v62, %v1801_v45  ;;  %3160 = vrcp.f32 %v1469_v29  ;;  %v1478_v58 = vadd.f32 1.0, %v3141_v14  ;;  %v4902_v19 = vld [vmem:[#allocation18_spill] sm:$0xff]  ;;  %v4904_v12 = vld [vmem:[#allocation25_spill] sm:$0xff] }
 0x1a6   : > { %v3145_v61 = vpop.eup %3144  ;;  %2433 = vst [vmem:[%s4772_s3 + $0x10] sm:$0xff] %v2423_v2  ;;  %v2368_v41 = vsel %vm2346_vm6, %v2217_v18, %v4276_v33  ;;  %v1810_v39 = vrot.slane %v1690_v52, 4  ;;  %3162 = vrcp.f32 %v1471_v5  ;;  %v1480_v24 = vadd.f32 1.0, %v3143_v60 }
 0x1a7   : > { %v3147_v20 = vpop.eup %3146  ;;  %2432 = vst [vmem:[%s4772_s3 + $0x8] sm:$0xff] %v2422_v32  ;;  %v2424_v10 = vadd.f32 %v2368_v41, %v1767_v1  ;;  %v1689_v49 = vmul.f32 %v3145_v61, %v4085_v44  ;;  %3164 = vrcp.f32 %v1478_v58  ;;  %v4352_v53 = vadd.f32 %v4898_v3, %v3846_v27  ;;  %v4905_v58 = vld [vmem:[#allocation7_spill] sm:$0xff] }
 0x1a8   : > { %v3149_v36 = vpop.eup %3148  ;;  %v1811_v17 = vadd.f32 %v1810_v39, %v1690_v52  ;;  %v1691_v33 = vmul.f32 %v3147_v20, %v4899_v35  ;;  %3166 = vrcp.f32 %v1480_v24  ;;  %v4357_v34 = vadd.f32 %v4900_v8, %v3854_v30 }
 0x1a9   : > { %v3151_v28 = vpop.eup %3150  ;;  %2434 = vst [vmem:[%s4772_s3 + $0x18] sm:$0xff] %v2424_v10  ;;  %v1804_v44 = vrot.slane %v1689_v49, 4  ;;  %v1698_v43 = vmul.f32 %v3149_v36, %v4901_v13  ;;  %3168 = vpow2.f32 %v4280_v9  ;;  %v4365_v54 = vmul.f32 -1.442695, %v4352_v53 }
 0x1aa   : > { %v3153_v45 = vpop.eup %3152  ;;  %v1812_v63 = vrot.slane %v1811_v17, 2  ;;  %v1816_v0 = vrot.slane %v1691_v33, 4  ;;  %v1700_v48 = vmul.f32 %v3151_v28, %v4902_v19  ;;  %3170 = vpow2.f32 %v4289_v25 }
 0x1ab   : > { %v3155_v40 = vpop.eup %3154  ;;  %v1805_v29 = vadd.f32 %v1804_v44, %v1689_v49  ;;  %v1858_v42 = vrot.slane %v1698_v43, 4  ;;  %v1699_v62 = vmul.f32 %v3153_v45, %v4903_v4  ;;  %3172 = vpow2.f32 %v4298_v21 }
 0x1ac   : > { %v3157_v5 = vpop.eup %3156  ;;  %v1813_v14 = vadd.f32 %v1812_v63, %v1811_v17  ;;  %v1817_v9 = vadd.f32 %v1816_v0, %v1691_v33  ;;  %v1870_v2 = vrot.slane %v1700_v48, 4  ;;  %v1701_v1 = vmul.f32 %v3155_v40, %v4904_v12  ;;  %v4906_v40 = vld [vmem:[#allocation27_spill] sm:$0xff] }
 0x1ad   : > { %v3159_v18 = vpop.eup %3158  ;;  %v1806_v52 = vrot.slane %v1805_v29, 2  ;;  %v1859_v60 = vadd.f32 %v1858_v42, %v1698_v43  ;;  %v1864_v32 = vrot.slane %v1699_v62, 4  ;;  %v1708_v61 = vmul.f32 %v3157_v5, %v4905_v58 }
 0x1ae   : > { %v1814_v25 = vrot.slane %v1813_v14, 1  ;;  %v1818_v41 = vrot.slane %v1817_v9, 2  ;;  %v1871_v39 = vadd.f32 %v1870_v2, %v1700_v48  ;;  %v1876_v24 = vrot.slane %v1701_v1, 4 }
 0x1af   : > { %v3161_v20 = vpop.eup %3160  ;;  %v1807_v10 = vadd.f32 %v1806_v52, %v1805_v29  ;;  %v1860_v49 = vrot.slane %v1859_v60, 2  ;;  %v1865_v21 = vadd.f32 %v1864_v32, %v1699_v62  ;;  %v1918_v3 = vrot.slane %v1708_v61, 4 }
 0x1b0   : > { %v3163_v36 = vpop.eup %3162  ;;  %v1815_v17 = vadd.f32 %v1814_v25, %v1813_v14  ;;  %v1819_v35 = vadd.f32 %v1818_v41, %v1817_v9  ;;  %v1872_v33 = vrot.slane %v1871_v39, 2  ;;  %v1877_v8 = vadd.f32 %v1876_v24, %v1701_v1  ;;  %v4907_v25 = vld [vmem:[#allocation9_spill] sm:$0xff] }
 0x1b1   : > { %v3165_v28 = vpop.eup %3164  ;;  %v1808_v44 = vrot.slane %v1807_v10, 1  ;;  %v1861_v13 = vadd.f32 %v1860_v49, %v1859_v60  ;;  %v1866_v43 = vrot.slane %v1865_v21, 2  ;;  %v1919_v45 = vadd.f32 %v1918_v3, %v1708_v61 }
 0x1b2   : > { %v3167_v63 = vpop.eup %3166  ;;  %v1820_v0 = vrot.slane %v1819_v35, 1  ;;  %v1873_v19 = vadd.f32 %v1872_v33, %v1871_v39  ;;  %v1878_v48 = vrot.slane %v1877_v8, 2  ;;  %v1710_v42 = vmul.f32 %v3159_v18, %v4906_v40 }
 0x1b3   : > { %v3169_v29 = vpop.eup %3168  ;;  %v1809_v4 = vadd.f32 %v1808_v44, %v1807_v10  ;;  %v1862_v62 = vrot.slane %v1861_v13, 1  ;;  %v1867_v5 = vadd.f32 %v1866_v43, %v1865_v21  ;;  %v1920_v2 = vrot.slane %v1919_v45, 2 }
 0x1b4   : > { %v3171_v14 = vpop.eup %3170  ;;  %v1821_v9 = vadd.f32 %v1820_v0, %v1819_v35  ;;  %v1874_v12 = vrot.slane %v1873_v19, 1  ;;  %v1879_v1 = vadd.f32 %v1878_v48, %v1877_v8  ;;  %v1930_v52 = vrot.slane %v1710_v42, 4 }
 0x1b5   : > { %v3173_v32 = vpop.eup %3172  ;;  %v1863_v60 = vadd.f32 %v1862_v62, %v1861_v13  ;;  %v1868_v58 = vrot.slane %v1867_v5, 1  ;;  %v1921_v61 = vadd.f32 %v1920_v2, %v1919_v45  ;;  %v1709_v41 = vmul.f32 %v3161_v20, %v4907_v25 }
 0x1b6   : > { %v1875_v39 = vadd.f32 %v1874_v12, %v1873_v19  ;;  %v1880_v24 = vrot.slane %v1879_v1, 1  ;;  %v1931_v49 = vadd.f32 %v1930_v52, %v1710_v42  ;;  %v1711_v18 = vmul.f32 %v3163_v36, %v4200_v7 }
 0x1b7   : > { %v2369_v10 = vsel %vm2334_vm0, %v1863_v60, %v4339_v16  ;;  %v1869_v21 = vadd.f32 %v1868_v58, %v1867_v5  ;;  %v1922_v3 = vrot.slane %v1921_v61, 1  ;;  %v1924_v35 = vrot.slane %v1709_v41, 4 }
 0x1b8   : > { %v2383_v33 = vsel %vm2334_vm0, %v1875_v39, %v1815_v17  ;;  %v1881_v8 = vadd.f32 %v1880_v24, %v1879_v1  ;;  %v1932_v44 = vrot.slane %v1931_v49, 2  ;;  %v1936_v13 = vrot.slane %v1711_v18, 4 }
 0x1b9   : > { %v2376_v43 = vsel %vm2334_vm0, %v1869_v21, %v1809_v4  ;;  %v1923_v45 = vadd.f32 %v1922_v3, %v1921_v61  ;;  %v1925_v20 = vadd.f32 %v1924_v35, %v1709_v41  ;;  %v1718_v0 = vmul.f32 %v3165_v28, %v4242_v23 }
 0x1ba   : > { %v2390_v19 = vsel %vm2334_vm0, %v1881_v8, %v1821_v9  ;;  %v1933_v7 = vadd.f32 %v1932_v44, %v1931_v49  ;;  %v1937_v36 = vadd.f32 %v1936_v13, %v1711_v18  ;;  %v1720_v16 = vmul.f32 %v3167_v63, %v4248_v6  ;;  %v4909_v49 = vld [vmem:[#allocation37_spill] sm:$0xff]  ;;  %v4911_v44 = vld [vmem:[#allocation39_spill] sm:$0xff] }
 0x1bb   : > { %v2370_v48 = vsel %vm2336_vm1, %v1923_v45, %v2369_v10  ;;  %v1926_v40 = vrot.slane %v1925_v20, 2  ;;  %v1978_v42 = vrot.slane %v1718_v0, 4  ;;  %v1479_v17 = vadd.f32 1.0, %v3169_v29 }
 0x1bc   : > { %v1934_v62 = vrot.slane %v1933_v7, 1  ;;  %v1938_v5 = vrot.slane %v1937_v36, 2  ;;  %v1990_v2 = vrot.slane %v1720_v16, 4  ;;  %v1481_v12 = vadd.f32 1.0, %v3171_v14 }
 0x1bd   : > { %v1927_v4 = vadd.f32 %v1926_v40, %v1925_v20  ;;  %v1979_v1 = vadd.f32 %v1978_v42, %v1718_v0  ;;  %3174 = vrcp.f32 %v1479_v17  ;;  %v1488_v52 = vadd.f32 1.0, %v3173_v32  ;;  %v4908_v32 = vld [vmem:[#allocation36_spill] sm:$0xff]  ;;  %v4913_v20 = vld [vmem:[#allocation41_spill] sm:$0xff] }
 0x1be   : > { %v1935_v23 = vadd.f32 %v1934_v62, %v1933_v7  ;;  %v1939_v28 = vadd.f32 %v1938_v5, %v1937_v36  ;;  %v1991_v9 = vadd.f32 %v1990_v2, %v1720_v16  ;;  %3176 = vrcp.f32 %v1481_v12 }
 0x1bf   : > { %v1928_v60 = vrot.slane %v1927_v4, 1  ;;  %v1980_v58 = vrot.slane %v1979_v1, 2  ;;  %3178 = vrcp.f32 %v1488_v52  ;;  %v2772_v6 = vmul.f32 -1.442695, %v4357_v34 }
 0x1c0   : > { %v2384_v63 = vsel %vm2336_vm1, %v1935_v23, %v2383_v33  ;;  %v1940_v29 = vrot.slane %v1939_v28, 1  ;;  %v1992_v61 = vrot.slane %v1991_v9, 2  ;;  %3180 = vpow2.f32 %v4303_v59  ;;  %v4910_v33 = vld [vmem:[#allocation38_spill] sm:$0xff] }
 0x1c1   : > { %v1929_v14 = vadd.f32 %v1928_v60, %v1927_v4  ;;  %v1981_v25 = vadd.f32 %v1980_v58, %v1979_v1  ;;  %3182 = vpow2.f32 %v4319_v56  ;;  %v4390_v41 = vadd.f32 %v4908_v32, %v3859_v31 }
 0x1c2   : > { %v1941_v39 = vadd.f32 %v1940_v29, %v1939_v28  ;;  %v1993_v24 = vadd.f32 %v1992_v61, %v1991_v9  ;;  %3184 = vpow2.f32 %v4323_v38  ;;  %v4395_v18 = vadd.f32 %v4909_v49, %v3867_v50 }
 0x1c3   : > { %v4398_v10 = vsel %vm2336_vm1, %v1929_v14, %v2376_v43  ;;  %v1982_v59 = vrot.slane %v1981_v25, 1  ;;  %3186 = vpow2.f32 %v4365_v54  ;;  %v2771_v56 = vmul.f32 -1.442695, %v4390_v41  ;;  %v4912_v43 = vld [vmem:[#allocation40_spill] sm:$0xff] }
 0x1c4   : > { %v4403_v21 = vsel %vm2336_vm1, %v1941_v39, %v2390_v19  ;;  %v1994_v3 = vrot.slane %v1993_v24, 1  ;;  %3188 = vpow2.f32 %v2772_v6  ;;  %v2773_v35 = vmul.f32 -1.442695, %v4395_v18 }
 0x1c5   : > { %v1983_v38 = vadd.f32 %v1982_v59, %v1981_v25  ;;  %3190 = vpow2.f32 %v2771_v56  ;;  %v4408_v8 = vadd.f32 %v4910_v33, %v3846_v27  ;;  %v4412_v13 = vadd.f32 %v4911_v44, %v3854_v30  ;;  %v4915_v59 = vld [vmem:[#allocation43_spill] sm:$0xff] }
 0x1c6   : > { %v1995_v54 = vadd.f32 %v1994_v3, %v1993_v24  ;;  %3192 = vpow2.f32 %v2773_v35  ;;  %v4416_v45 = vadd.f32 %v4912_v43, %v3859_v31  ;;  %v4420_v0 = vadd.f32 %v4913_v20, %v3867_v50  ;;  %v362_v3 = vld [vmem:[%s4771_s2 + $0x8] sm:$0x3] }
 0x1c7   : > { %v3175_v19 = vpop.eup %3174  ;;  %v4423_v7 = vsel %vm2338_vm2, %v1983_v38, %v2370_v48  ;;  %v2780_v36 = vmul.f32 -1.442695, %v4408_v8  ;;  %v2782_v16 = vmul.f32 -1.442695, %v4412_v13  ;;  %v4914_v48 = vld [vmem:[#allocation42_spill] sm:$0xff]  ;;  %v4442_v56 = vadd.f32 %v4915_v59, %v3854_v30  ;;  %v4916_v20 = vld [vmem:[#allocation44_spill] sm:$0xff] }
 0x1c8   : > { %v3177_v40 = vpop.eup %3176  ;;  %v4428_v42 = vsel %vm2338_vm2, %v1995_v54, %v2384_v63  ;;  %v1719_v17 = vmul.f32 %v3175_v19, %v4262_v51  ;;  %v2781_v62 = vmul.f32 -1.442695, %v4416_v45  ;;  %v2783_v5 = vmul.f32 -1.442695, %v4420_v0  ;;  %v4917_v30 = vld [vmem:[#allocation4_spill] sm:$0xff] }
 0x1c9   : > { %v3179_v2 = vpop.eup %3178  ;;  %v1721_v12 = vmul.f32 %v3177_v40, %v4273_v57  ;;  %3194 = vpow2.f32 %v2780_v36  ;;  %v4436_v4 = vadd.f32 %v4914_v48, %v3846_v27  ;;  %v4449_v19 = vadd.f32 %v4916_v20, %v3859_v31 }
 0x1ca   : > { %v3181_v1 = vpop.eup %3180  ;;  %v1984_v52 = vrot.slane %v1719_v17, 4  ;;  %v1728_v23 = vmul.f32 %v3179_v2, %v4284_v11  ;;  %3196 = vpow2.f32 %v2782_v16  ;;  %v4452_v40 = vrot.slane %v362_v3, %v4917_v30  ;;  %v4918_v2 = vld [vmem:[#allocation45_spill] sm:$0xff] }
 0x1cb   : > { %v3183_v28 = vpop.eup %3182  ;;  %v1996_v9 = vrot.slane %v1721_v12, 4  ;;  %v1490_v51 = vadd.f32 1.0, %v3181_v1  ;;  %3198 = vpow2.f32 %v2781_v62  ;;  %v2790_v27 = vmul.f32 -1.442695, %v4436_v4 }
 0x1cc   : > { %v3185_v60 = vpop.eup %3184  ;;  %v1985_v58 = vadd.f32 %v1984_v52, %v1719_v17  ;;  %v2038_v6 = vrot.slane %v1728_v23, 4  ;;  %v1489_v63 = vadd.f32 1.0, %v3183_v28  ;;  %3200 = vpow2.f32 %v2783_v5 }
 0x1cd   : > { %v3187_v57 = vpop.eup %3186  ;;  %v1997_v29 = vadd.f32 %v1996_v9, %v1721_v12  ;;  %3202 = vrcp.f32 %v1490_v51  ;;  %v1491_v61 = vadd.f32 1.0, %v3185_v60  ;;  %v2792_v5 = vmul.f32 -1.442695, %v4442_v56  ;;  %v4919_v60 = vld [vmem:[#allocation48_spill] sm:$0xff] }
 0x1ce   : > { %v3189_v14 = vpop.eup %3188  ;;  %v1986_v25 = vrot.slane %v1985_v58, 2  ;;  %v2039_v32 = vadd.f32 %v2038_v6, %v1728_v23  ;;  %3204 = vrcp.f32 %v1489_v63  ;;  %v1498_v11 = vadd.f32 1.0, %v3187_v57 }
 0x1cf   : > { %v3191_v39 = vpop.eup %3190  ;;  %v1998_v24 = vrot.slane %v1997_v29, 2  ;;  %3206 = vrcp.f32 %v1491_v61  ;;  %v1500_v49 = vadd.f32 1.0, %v3189_v14  ;;  %v4457_v12 = vadd.f32 %v4918_v2, %v3867_v50  ;;  %v4920_v14 = vld [vmem:[#allocation5_spill] sm:$0xff] }
 0x1d0   : > { %v3193_v35 = vpop.eup %3192  ;;  %v1987_v38 = vadd.f32 %v1986_v25, %v1985_v58  ;;  %v2040_v33 = vrot.slane %v2039_v32, 2  ;;  %3208 = vrcp.f32 %v1498_v11  ;;  %v1499_v44 = vadd.f32 1.0, %v3191_v39 }
 0x1d1   : > { %v1999_v54 = vadd.f32 %v1998_v24, %v1997_v29  ;;  %3210 = vrcp.f32 %v1500_v49  ;;  %v1501_v43 = vadd.f32 1.0, %v3193_v35  ;;  %v2791_v51 = vmul.f32 -1.442695, %v4449_v19 }
 0x1d2   : > { %v1988_v36 = vrot.slane %v1987_v38, 1  ;;  %v2041_v16 = vadd.f32 %v2040_v33, %v2039_v32  ;;  %3212 = vrcp.f32 %v1499_v44  ;;  %v4462_v58 = vadd.f32 %v4919_v60, %v4452_v40 }
 0x1d3   : > { %v3195_v17 = vpop.eup %3194  ;;  %v2000_v62 = vrot.slane %v1999_v54, 1  ;;  %3214 = vrcp.f32 %v1501_v43  ;;  %v4473_v25 = vrot.slane %v362_v3, %v4920_v14  ;;  %v2793_v39 = vmul.f32 -1.442695, %v4457_v12 }
 0x1d4   : > { %v3197_v48 = vpop.eup %3196  ;;  %v1989_v1 = vadd.f32 %v1988_v36, %v1987_v38  ;;  %v2042_v52 = vrot.slane %v2041_v16, 1  ;;  %v1508_v31 = vadd.f32 1.0, %v3195_v17  ;;  %3216 = vpow2.f32 %v2790_v27 }
 0x1d5   : > { %v3199_v23 = vpop.eup %3198  ;;  %v2001_v28 = vadd.f32 %v2000_v62, %v1999_v54  ;;  %v1510_v9 = vadd.f32 1.0, %v3197_v48 }
 0x1d6   : > { %v3201_v6 = vpop.eup %3200  ;;  %v4466_v63 = vsel %vm2338_vm2, %v1989_v1, %v4398_v10  ;;  %v2043_v50 = vadd.f32 %v2042_v52, %v2041_v16  ;;  %3218 = vrcp.f32 %v1508_v31  ;;  %v1509_v57 = vadd.f32 1.0, %v3199_v23 }
 0x1d7   : > { %v3203_v29 = vpop.eup %3202  ;;  %v4470_v61 = vsel %vm2338_vm2, %v2001_v28, %v4403_v21  ;;  %v1511_v27 = vadd.f32 1.0, %v3201_v6  ;;  %3220 = vpow2.f32 %v2792_v5  ;;  %v2724_v21 = vmul.f32 -1.442695, %v4462_v58 }
 0x1d8   : > { %v3205_v32 = vpop.eup %3204  ;;  %v4477_v11 = vsel %vm2340_vm3, %v2043_v50, %v4423_v7  ;;  %v1730_v10 = vmul.f32 %v3203_v29, %v4293_v55  ;;  %3222 = vrcp.f32 %v1510_v9  ;;  %v4921_v55 = vld [vmem:[#allocation24_spill] sm:$0xff] }
 0x1d9   : > { %v3207_v24 = vpop.eup %3206  ;;  %v1729_v49 = vmul.f32 %v3205_v32, %v4307_v37  ;;  %3224 = vrcp.f32 %v1509_v57  ;;  %v4487_v44 = vadd.f32 %v4921_v55, %v4473_v25 }
 0x1da   : > { %v3209_v59 = vpop.eup %3208  ;;  %v2050_v35 = vrot.slane %v1730_v10, 4  ;;  %v1731_v3 = vmul.f32 %v3207_v24, %v4315_v15  ;;  %3226 = vrcp.f32 %v1511_v27 }
 0x1db   : > { %v3211_v38 = vpop.eup %3210  ;;  %v2044_v33 = vrot.slane %v1729_v49, 4  ;;  %v1738_v7 = vmul.f32 %v3209_v59, %v4352_v53  ;;  %3228 = vpow2.f32 %v2791_v51 }
 0x1dc   : > { %v3213_v54 = vpop.eup %3212  ;;  %v2051_v43 = vadd.f32 %v2050_v35, %v1730_v10  ;;  %v2056_v37 = vrot.slane %v1731_v3, 4  ;;  %v1740_v20 = vmul.f32 %v3211_v38, %v4357_v34  ;;  %3230 = vpow2.f32 %v2793_v39 }
 0x1dd   : > { %v3215_v36 = vpop.eup %3214  ;;  %v2045_v16 = vadd.f32 %v2044_v33, %v1729_v49  ;;  %v2098_v30 = vrot.slane %v1738_v7, 4  ;;  %v1739_v15 = vmul.f32 %v3213_v54, %v4390_v41  ;;  %3232 = vpow2.f32 %v2724_v21 }
 0x1de   : > { %v3217_v17 = vpop.eup %3216  ;;  %v2052_v62 = vrot.slane %v2051_v43, 2  ;;  %v2057_v53 = vadd.f32 %v2056_v37, %v1731_v3  ;;  %v2110_v5 = vrot.slane %v1740_v20, 4  ;;  %v1741_v2 = vmul.f32 %v3215_v36, %v4395_v18 }
 0x1df   : > { %v2046_v48 = vrot.slane %v2045_v16, 2  ;;  %v2099_v1 = vadd.f32 %v2098_v30, %v1738_v7  ;;  %v2104_v52 = vrot.slane %v1739_v15, 4  ;;  %v1518_v31 = vadd.f32 1.0, %v3217_v17 }
 0x1e0   : > { %v3219_v23 = vpop.eup %3218  ;;  %v2053_v28 = vadd.f32 %v2052_v62, %v2051_v43  ;;  %v2058_v34 = vrot.slane %v2057_v53, 2  ;;  %v2111_v9 = vadd.f32 %v2110_v5, %v1740_v20  ;;  %v2116_v51 = vrot.slane %v1741_v2, 4 }
 0x1e1   : > { %v3221_v60 = vpop.eup %3220  ;;  %v2047_v6 = vadd.f32 %v2046_v48, %v2045_v16  ;;  %v2100_v50 = vrot.slane %v2099_v1, 2  ;;  %v2105_v41 = vadd.f32 %v2104_v52, %v1739_v15  ;;  %v1748_v57 = vmul.f32 %v3219_v23, %v4408_v8 }
 0x1e2   : > { %v3223_v29 = vpop.eup %3222  ;;  %v2054_v27 = vrot.slane %v2053_v28, 1  ;;  %v2059_v14 = vadd.f32 %v2058_v34, %v2057_v53  ;;  %v2112_v32 = vrot.slane %v2111_v9, 2  ;;  %v2117_v18 = vadd.f32 %v2116_v51, %v1741_v2 }
 0x1e3   : > { %v3225_v10 = vpop.eup %3224  ;;  %v2048_v39 = vrot.slane %v2047_v6, 1  ;;  %v2101_v24 = vadd.f32 %v2100_v50, %v2099_v1  ;;  %v2106_v49 = vrot.slane %v2105_v41, 2  ;;  %v2158_v21 = vrot.slane %v1748_v57, 4 }
 0x1e4   : > { %v3227_v59 = vpop.eup %3226  ;;  %v2055_v35 = vadd.f32 %v2054_v27, %v2053_v28  ;;  %v2060_v3 = vrot.slane %v2059_v14, 1  ;;  %v2113_v38 = vadd.f32 %v2112_v32, %v2111_v9  ;;  %v2118_v33 = vrot.slane %v2117_v18, 2 }
 0x1e5   : > { %v3229_v7 = vpop.eup %3228  ;;  %v2049_v55 = vadd.f32 %v2048_v39, %v2047_v6  ;;  %v2102_v54 = vrot.slane %v2101_v24, 1  ;;  %v2107_v43 = vadd.f32 %v2106_v49, %v2105_v41  ;;  %v2159_v8 = vadd.f32 %v2158_v21, %v1748_v57  ;;  %v4922_v39 = vld [vmem:[#allocation49_spill] sm:$0xff] }
 0x1e6   : > { %v3231_v37 = vpop.eup %3230  ;;  %v2386_v20 = vsel %vm2340_vm3, %v2055_v35, %v4428_v42  ;;  %v2061_v36 = vadd.f32 %v2060_v3, %v2059_v14  ;;  %v2114_v16 = vrot.slane %v2113_v38, 1  ;;  %v2119_v30 = vadd.f32 %v2118_v33, %v2117_v18  ;;  %v4923_v3 = vld [vmem:[#allocation22_spill] sm:$0xff] }
 0x1e7   : > { %v3233_v15 = vpop.eup %3232  ;;  %v2379_v17 = vsel %vm2340_vm3, %v2049_v55, %v4466_v63  ;;  %v2103_v62 = vadd.f32 %v2102_v54, %v2101_v24  ;;  %v2108_v53 = vrot.slane %v2107_v43, 1  ;;  %v2160_v5 = vrot.slane %v2159_v8, 2  ;;  %v4924_v55 = vld [vmem:[#allocation26_spill] sm:$0xff] }
 0x1e8   : > { %v2393_v2 = vsel %vm2340_vm3, %v2061_v36, %v4470_v61  ;;  %v2115_v48 = vadd.f32 %v2114_v16, %v2113_v38  ;;  %v2120_v1 = vrot.slane %v2119_v30, 1  ;;  %v1750_v52 = vmul.f32 %v3223_v29, %v4412_v13 }
 0x1e9   : > { %v2373_v42 = vsel %vm2342_vm4, %v2103_v62, %v4477_v11  ;;  %v2109_v23 = vadd.f32 %v2108_v53, %v2107_v43  ;;  %v2161_v28 = vadd.f32 %v2160_v5, %v2159_v8  ;;  %v1749_v34 = vmul.f32 %v3225_v10, %v4416_v45  ;;  %v4925_v43 = vld [vmem:[#allocation28_spill] sm:$0xff]  ;;  %v4926_v53 = vld [vmem:[#allocation23_spill] sm:$0xff] }
 0x1ea   : > { %v2387_v9 = vsel %vm2342_vm4, %v2115_v48, %v2386_v20  ;;  %v2121_v63 = vadd.f32 %v2120_v1, %v2119_v30  ;;  %v2170_v51 = vrot.slane %v1750_v52, 4  ;;  %v1751_v6 = vmul.f32 %v3227_v59, %v4420_v0 }
 0x1eb   : > { %v2380_v50 = vsel %vm2342_vm4, %v2109_v23, %v2379_v17  ;;  %v2162_v61 = vrot.slane %v2161_v28, 1  ;;  %v2164_v41 = vrot.slane %v1749_v34, 4  ;;  %3234 = vrcp.f32 %v1518_v31 }
 0x1ec   : > { %v2394_v13 = vsel %vm2342_vm4, %v2121_v63, %v2393_v2  ;;  %v2171_v57 = vadd.f32 %v2170_v51, %v1750_v52  ;;  %v2176_v29 = vrot.slane %v1751_v6, 4  ;;  %v1520_v11 = vadd.f32 1.0, %v3221_v60  ;;  %v4927_v51 = vld [vmem:[#allocation10_spill] sm:$0xff] }
 0x1ed   : > { %v2163_v27 = vadd.f32 %v2162_v61, %v2161_v28  ;;  %v2165_v14 = vadd.f32 %v2164_v41, %v1749_v34  ;;  %v1519_v32 = vadd.f32 1.0, %v3229_v7  ;;  %v1521_v45 = vadd.f32 1.0, %v3231_v37 }
 0x1ee   : > { %v2172_v18 = vrot.slane %v2171_v57, 2  ;;  %v2177_v10 = vadd.f32 %v2176_v29, %v1751_v6  ;;  %3236 = vrcp.f32 %v1520_v11  ;;  %v4509_v0 = vadd.f32 %v4922_v39, %v4452_v40  ;;  %v4928_v6 = vld [vmem:[#allocation29_spill] sm:$0xff] }
 0x1ef   : > { %v4512_v24 = vsel %vm2344_vm5, %v2163_v27, %v2373_v42  ;;  %v2166_v31 = vrot.slane %v2165_v14, 2  ;;  %3238 = vrcp.f32 %v1519_v32  ;;  %v2725_v49 = vmul.f32 -1.442695, %v4487_v44 }
 0x1f0   : > { %v2173_v21 = vadd.f32 %v2172_v18, %v2171_v57  ;;  %v2178_v60 = vrot.slane %v2177_v10, 2  ;;  %3240 = vrcp.f32 %v1521_v45  ;;  %v1452_v59 = vadd.f32 1.0, %v3233_v15 }
 0x1f1   : > { %v2167_v35 = vadd.f32 %v2166_v31, %v2165_v14  ;;  %v4517_v38 = vadd.f32 %v4923_v3, %v4452_v40  ;;  %v4521_v54 = vadd.f32 %v4924_v55, %v4452_v40  ;;  %v4525_v8 = vadd.f32 %v4925_v43, %v4473_v25 }
 0x1f2   : > { %v2174_v33 = vrot.slane %v2173_v21, 1  ;;  %v2179_v7 = vadd.f32 %v2178_v60, %v2177_v10  ;;  %v2764_v20 = vmul.f32 -1.442695, %v4509_v0  ;;  %3242 = vpow2.f32 %v2725_v49 }
 0x1f3   : > { %v2168_v37 = vrot.slane %v2167_v35, 1  ;;  %v2734_v36 = vmul.f32 -1.442695, %v4517_v38  ;;  %3244 = vrcp.f32 %v1452_v59  ;;  %v2735_v62 = vmul.f32 -1.442695, %v4525_v8 }
 0x1f4   : > { %v2175_v16 = vadd.f32 %v2174_v33, %v2173_v21  ;;  %v2180_v30 = vrot.slane %v2179_v7, 1  ;;  %v4532_v5 = vadd.f32 %v4926_v53, %v4452_v40  ;;  %v2774_v52 = vmul.f32 -1.442695, %v4521_v54 }
 0x1f5   : > { %v3235_v15 = vpop.eup %3234  ;;  %v2169_v17 = vadd.f32 %v2168_v37, %v2167_v35  ;;  %3246 = vpow2.f32 %v2734_v36 }
 0x1f6   : > { %v4535_v2 = vsel %vm2344_vm5, %v2175_v16, %v2387_v9  ;;  %v2181_v48 = vadd.f32 %v2180_v30, %v2179_v7  ;;  %v1758_v1 = vmul.f32 %v3235_v15, %v4436_v4  ;;  %3248 = vpow2.f32 %v2764_v20  ;;  %v1768_v30 = vld [vmem:[%s4772_s3 + $0x20] sm:$0xff] }
 0x1f7   : > { %v4540_v42 = vsel %vm2344_vm5, %v2169_v17, %v2380_v50  ;;  %v2744_v23 = vmul.f32 -1.442695, %v4532_v5  ;;  %v4548_v9 = vadd.f32 %v4927_v51, %v4452_v40  ;;  %v4552_v4 = vadd.f32 %v4928_v6, %v4473_v25 }
 0x1f8   : > { %v3237_v28 = vpop.eup %3236  ;;  %v4544_v34 = vsel %vm2344_vm5, %v2181_v48, %v2394_v13  ;;  %v2218_v63 = vrot.slane %v1758_v1, 4  ;;  %3250 = vpow2.f32 %v2735_v62  ;;  %v4929_v13 = vld [vmem:[#allocation6_spill] sm:$0xff] }
 0x1f9   : > { %v3239_v61 = vpop.eup %3238  ;;  %v1760_v50 = vmul.f32 %v3237_v28, %v4442_v56  ;;  %v4558_v11 = vadd.f32 %v4929_v13, %v4473_v25  ;;  %3252 = vpow2.f32 %v2774_v52  ;;  %v2784_v32 = vmul.f32 -1.442695, %v4548_v9  ;;  %v1769_v13 = vld [vmem:[%s4772_s3 + $0x28] sm:$0xff] }
 0x1fa   : > { %v3241_v41 = vpop.eup %3240  ;;  %v2219_v57 = vadd.f32 %v2218_v63, %v1758_v1  ;;  %v1759_v29 = vmul.f32 %v3239_v61, %v4449_v19  ;;  %v2745_v45 = vmul.f32 -1.442695, %v4552_v4  ;;  %3254 = vpow2.f32 %v2744_v23  ;;  %v4930_v19 = vld [vmem:[#allocation8_spill] sm:$0xff]  ;;  %v4931_v23 = vld [vmem:[#allocation30_spill] sm:$0xff] }
 0x1fb   : > { %v2230_v27 = vrot.slane %v1760_v50, 4  ;;  %v1761_v14 = vmul.f32 %v3241_v41, %v4457_v12  ;;  %v4565_v49 = vadd.f32 %v4930_v19, %v4473_v25  ;;  %v2765_v7 = vmul.f32 -1.442695, %v4558_v11 }
 0x1fc   : > { %v2220_v18 = vrot.slane %v2219_v57, 2  ;;  %v2224_v10 = vrot.slane %v1759_v29, 4  ;;  %v3243_v56 = vpop.eup %3242  ;;  %3256 = vpow2.f32 %v2745_v45  ;;  %v4575_v28 = vadd.f32 %v4931_v23, %v4473_v25 }
 0x1fd   : > { %v2231_v39 = vadd.f32 %v2230_v27, %v1760_v50  ;;  %v2236_v31 = vrot.slane %v1761_v14, 4  ;;  %v3245_v21 = vpop.eup %3244  ;;  %v1453_v35 = vadd.f32 1.0, %v3243_v56  ;;  %3258 = vpow2.f32 %v2784_v32 }
 0x1fe   : > { %v2221_v60 = vadd.f32 %v2220_v18, %v2219_v57  ;;  %v2225_v59 = vadd.f32 %v2224_v10, %v1759_v29  ;;  %v2775_v16 = vmul.f32 -1.442695, %v4565_v49  ;;  %v1692_v62 = vmul.f32 %v3245_v21, %v4462_v58  ;;  %v1770_v58 = vld [vmem:[%s4772_s3 + $0x30] sm:$0xff]  ;;  %v1771_v18 = vld [vmem:[%s4772_s3 + $0x38] sm:$0xff] }
 0x1ff   : > { %v3247_v12 = vpop.eup %3246  ;;  %v2232_v3 = vrot.slane %v2231_v39, 2  ;;  %v2237_v33 = vadd.f32 %v2236_v31, %v1761_v14  ;;  %3260 = vrcp.f32 %v1453_v35  ;;  %v2785_v56 = vmul.f32 -1.442695, %v4575_v28 }
 0x200   : > { %v2222_v55 = vrot.slane %v2221_v60, 1  ;;  %v2226_v43 = vrot.slane %v2225_v59, 2  ;;  %v3249_v37 = vpop.eup %3248  ;;  %v1462_v53 = vadd.f32 1.0, %v3247_v12  ;;  %3262 = vpow2.f32 %v2765_v7 }
 0x201   : > { %v2233_v20 = vadd.f32 %v2232_v3, %v2231_v39  ;;  %v2238_v36 = vrot.slane %v2237_v33, 2  ;;  %v1492_v61 = vadd.f32 1.0, %v3249_v37  ;;  %v1822_v14 = vrot.slane %v1692_v62, 4 }
 0x202   : > { %v2223_v15 = vadd.f32 %v2222_v55, %v2221_v60  ;;  %v2227_v17 = vadd.f32 %v2226_v43, %v2225_v59  ;;  %v3251_v48 = vpop.eup %3250  ;;  %3264 = vrcp.f32 %v1462_v53  ;;  %v4596_v39 = vadd.f32 %v4234_v26, %v4452_v40 }
 0x203   : > { %v2234_v1 = vrot.slane %v2233_v20, 1  ;;  %v2239_v52 = vadd.f32 %v2238_v36, %v2237_v33  ;;  %v3253_v63 = vpop.eup %3252  ;;  %3266 = vpow2.f32 %v2775_v16  ;;  %v1463_v32 = vadd.f32 1.0, %v3251_v48 }
 0x204   : > { %v2375_v51 = vsel %vm2346_vm6, %v2223_v15, %v4512_v24  ;;  %v2228_v6 = vrot.slane %v2227_v17, 1  ;;  %v3255_v29 = vpop.eup %3254  ;;  %v1502_v59 = vadd.f32 1.0, %v3253_v63  ;;  %v1823_v26 = vadd.f32 %v1822_v14, %v1692_v62 }
 0x205   : > { %v2425_v50 = vadd.f32 %v2375_v51, %v1768_v30  ;;  %v2235_v41 = vadd.f32 %v2234_v1, %v2233_v20  ;;  %v2240_v57 = vrot.slane %v2239_v52, 1  ;;  %3268 = vrcp.f32 %v1463_v32 }
 0x206   : > { %v2229_v27 = vadd.f32 %v2228_v6, %v2227_v17  ;;  %v3257_v24 = vpop.eup %3256  ;;  %3270 = vrcp.f32 %v1492_v61  ;;  %v1472_v3 = vadd.f32 1.0, %v3255_v29  ;;  %v4612_v7 = vadd.f32 %v4237_v22, %v4452_v40 }
 0x207   : > { %2435 = vst [vmem:[%s4772_s3 + $0x20] sm:$0xff] %v2425_v50  ;;  %v2389_v45 = vsel %vm2346_vm6, %v2235_v41, %v4535_v2  ;;  %v2241_v10 = vadd.f32 %v2240_v57, %v2239_v52  ;;  %v3259_v21 = vpop.eup %3258  ;;  %v1473_v33 = vadd.f32 1.0, %v3257_v24  ;;  %3272 = vpow2.f32 %v2785_v56 }
 0x208   : > { %v2427_v31 = vadd.f32 %v2389_v45, %v1770_v58  ;;  %v2382_v19 = vsel %vm2346_vm6, %v2229_v27, %v4540_v42  ;;  %3274 = vrcp.f32 %v1472_v3  ;;  %v1512_v55 = vadd.f32 1.0, %v3259_v21 }
 0x209   : > { %v2426_v60 = vadd.f32 %v2382_v19, %v1769_v13  ;;  %v2396_v2 = vsel %vm2346_vm6, %v2241_v10, %v4544_v34  ;;  %v3261_v35 = vpop.eup %3260  ;;  %v2754_v34 = vmul.f32 -1.442695, %v4596_v39  ;;  %v4619_v43 = vadd.f32 %v4254_v46, %v4473_v25 }
 0x20a   : > { %2437 = vst [vmem:[%s4772_s3 + $0x30] sm:$0xff] %v2427_v31  ;;  %v2428_v12 = vadd.f32 %v2396_v2, %v1771_v18  ;;  %v1693_v42 = vmul.f32 %v3261_v35, %v4487_v44  ;;  %v4623_v44 = vadd.f32 %v4256_v47, %v4473_v25  ;;  %v3263_v37 = vpop.eup %3262  ;;  %3276 = vrcp.f32 %v1502_v59 }
 0x20b   : > { %2436 = vst [vmem:[%s4772_s3 + $0x28] sm:$0xff] %v2426_v60  ;;  %v2794_v22 = vmul.f32 -1.442695, %v4612_v7  ;;  %v1824_v36 = vrot.slane %v1823_v26, 2  ;;  %3278 = vrcp.f32 %v1473_v33  ;;  %v2755_v16 = vmul.f32 -1.442695, %v4619_v43 }
 0x20c   : > { %2438 = vst [vmem:[%s4772_s3 + $0x38] sm:$0xff] %v2428_v12  ;;  %v1828_v20 = vrot.slane %v1693_v42, 4  ;;  %v3265_v40 = vpop.eup %3264  ;;  %3280 = vpow2.f32 %v2754_v34  ;;  %v2795_v46 = vmul.f32 -1.442695, %v4623_v44  ;;  %v1493_v47 = vadd.f32 1.0, %v3263_v37 }
 0x20d   : > { %v3267_v30 = vpop.eup %3266  ;;  %v1702_v17 = vmul.f32 %v3265_v40, %v4517_v38  ;;  %3282 = vrcp.f32 %v1512_v55  ;;  %v1825_v52 = vadd.f32 %v1824_v36, %v1823_v26 }
 0x20e   : > { %v1829_v15 = vadd.f32 %v1828_v20, %v1693_v42  ;;  %3284 = vpow2.f32 %v2794_v22  ;;  %v1503_v48 = vadd.f32 1.0, %v3267_v30 }
 0x20f   : > { %v1882_v25 = vrot.slane %v1702_v17, 4  ;;  %v3269_v62 = vpop.eup %3268  ;;  %3286 = vpow2.f32 %v2755_v16  ;;  %v1826_v57 = vrot.slane %v1825_v52, 1 }
 0x210   : > { %v1830_v53 = vrot.slane %v1829_v15, 2  ;;  %v3271_v1 = vpop.eup %3270  ;;  %v1703_v63 = vmul.f32 %v3269_v62, %v4525_v8  ;;  %3288 = vpow2.f32 %v2795_v46 }
 0x211   : > { %v1883_v23 = vadd.f32 %v1882_v25, %v1702_v17  ;;  %v3273_v51 = vpop.eup %3272  ;;  %3290 = vrcp.f32 %v1493_v47  ;;  %v1827_v19 = vadd.f32 %v1826_v57, %v1825_v52 }
 0x212   : > { %v1888_v6 = vrot.slane %v1703_v63, 4  ;;  %v3275_v61 = vpop.eup %3274  ;;  %v1831_v50 = vadd.f32 %v1830_v53, %v1829_v15  ;;  %3292 = vrcp.f32 %v1503_v48  ;;  %v1513_v58 = vadd.f32 1.0, %v3273_v51 }
 0x213   : > { %v1884_v38 = vrot.slane %v1883_v23, 2  ;;  %v1712_v14 = vmul.f32 %v3275_v61, %v4532_v5  ;;  %v1732_v5 = vmul.f32 %v3271_v1, %v4509_v0 }
 0x214   : > { %v3277_v41 = vpop.eup %3276  ;;  %v1889_v13 = vadd.f32 %v1888_v6, %v1703_v63  ;;  %v1832_v10 = vrot.slane %v1831_v50, 1  ;;  %3294 = vrcp.f32 %v1513_v58 }
 0x215   : > { %v1885_v29 = vadd.f32 %v1884_v38, %v1883_v23  ;;  %v3279_v27 = vpop.eup %3278  ;;  %v1942_v56 = vrot.slane %v1712_v14, 4  ;;  %v1742_v34 = vmul.f32 %v3277_v41, %v4521_v54  ;;  %v2062_v47 = vrot.slane %v1732_v5, 4 }
 0x216   : > { %v3281_v32 = vpop.eup %3280  ;;  %v1890_v45 = vrot.slane %v1889_v13, 2  ;;  %v1713_v8 = vmul.f32 %v3279_v27, %v4552_v4  ;;  %v1833_v4 = vadd.f32 %v1832_v10, %v1831_v50 }
 0x217   : > { %v1886_v24 = vrot.slane %v1885_v29, 1  ;;  %v3283_v18 = vpop.eup %3282  ;;  %v1943_v35 = vadd.f32 %v1942_v56, %v1712_v14  ;;  %v1482_v12 = vadd.f32 1.0, %v3281_v32  ;;  %v2122_v62 = vrot.slane %v1742_v34, 4 }
 0x218   : > { %v3285_v31 = vpop.eup %3284  ;;  %v1891_v60 = vadd.f32 %v1890_v45, %v1889_v13  ;;  %v1948_v2 = vrot.slane %v1713_v8, 4  ;;  %v1752_v15 = vmul.f32 %v3283_v18, %v4548_v9  ;;  %v2063_v51 = vadd.f32 %v2062_v47, %v1732_v5 }
 0x219   : > { %v1887_v21 = vadd.f32 %v1886_v24, %v1885_v29  ;;  %v3287_v59 = vpop.eup %3286  ;;  %v1944_v55 = vrot.slane %v1943_v35, 2  ;;  %3296 = vrcp.f32 %v1482_v12  ;;  %v1522_v40 = vadd.f32 1.0, %v3285_v31 }
 0x21a   : > { %v3289_v26 = vpop.eup %3288  ;;  %v1892_v33 = vrot.slane %v1891_v60, 1  ;;  %v1949_v42 = vadd.f32 %v1948_v2, %v1713_v8  ;;  %v1483_v36 = vadd.f32 1.0, %v3287_v59  ;;  %v2182_v23 = vrot.slane %v1752_v15, 4 }
 0x21b   : > { %v2397_v3 = vsel %vm2334_vm0, %v1887_v21, %v1827_v19  ;;  %v3291_v37 = vpop.eup %3290  ;;  %v1945_v30 = vadd.f32 %v1944_v55, %v1943_v35  ;;  %v1523_v17 = vadd.f32 1.0, %v3289_v26  ;;  %3298 = vrcp.f32 %v1522_v40 }
 0x21c   : > { %v1893_v20 = vadd.f32 %v1892_v33, %v1891_v60  ;;  %v1950_v22 = vrot.slane %v1949_v42, 2  ;;  %v3293_v16 = vpop.eup %3292  ;;  %v1733_v25 = vmul.f32 %v3291_v37, %v4558_v11  ;;  %3300 = vrcp.f32 %v1483_v36 }
 0x21d   : > { %v1946_v54 = vrot.slane %v1945_v30, 1  ;;  %v1743_v53 = vmul.f32 %v3293_v16, %v4565_v49  ;;  %3302 = vrcp.f32 %v1523_v17  ;;  %v2123_v61 = vadd.f32 %v2122_v62, %v1742_v34 }
 0x21e   : > { %v2404_v0 = vsel %vm2334_vm0, %v1893_v20, %v1833_v4  ;;  %v1951_v46 = vadd.f32 %v1950_v22, %v1949_v42  ;;  %v3295_v1 = vpop.eup %3294  ;;  %v2068_v38 = vrot.slane %v1733_v25, 4  ;;  %v2183_v41 = vadd.f32 %v2182_v23, %v1752_v15 }
 0x21f   : > { %v1947_v52 = vadd.f32 %v1946_v54, %v1945_v30  ;;  %v1753_v9 = vmul.f32 %v3295_v1, %v4575_v28  ;;  %v2128_v50 = vrot.slane %v1743_v53, 4  ;;  %v2064_v29 = vrot.slane %v2063_v51, 2 }
 0x220   : > { %v1952_v48 = vrot.slane %v1951_v46, 1  ;;  %v2069_v13 = vadd.f32 %v2068_v38, %v1733_v25  ;;  %v2124_v14 = vrot.slane %v2123_v61, 2  ;;  %v2184_v45 = vrot.slane %v2183_v41, 2 }
 0x221   : > { %v2398_v6 = vsel %vm2336_vm1, %v1947_v52, %v2397_v3  ;;  %v2188_v49 = vrot.slane %v1753_v9, 4  ;;  %v2129_v32 = vadd.f32 %v2128_v50, %v1743_v53  ;;  %v2065_v19 = vadd.f32 %v2064_v29, %v2063_v51 }
 0x222   : > { %v1953_v63 = vadd.f32 %v1952_v48, %v1951_v46  ;;  %v2070_v21 = vrot.slane %v2069_v13, 2  ;;  %v2125_v2 = vadd.f32 %v2124_v14, %v2123_v61  ;;  %v2185_v26 = vadd.f32 %v2184_v45, %v2183_v41  ;;  %v2445_v45 = vld [vmem:[%s4771_s2] sm:$0xff] (!%p2796_p10) }
 0x223   : > { %v3297_v58 = vpop.eup %3296  ;;  %v2189_v8 = vadd.f32 %v2188_v49, %v1753_v9  ;;  %v2130_v59 = vrot.slane %v2129_v32, 2 }
 0x224   : > { %v4642_v11 = vsel %vm2336_vm1, %v1953_v63, %v2404_v0  ;;  %v1722_v57 = vmul.f32 %v3297_v58, %v4596_v39  ;;  %v2071_v34 = vadd.f32 %v2070_v21, %v2069_v13  ;;  %v2186_v36 = vrot.slane %v2185_v26, 1  ;;  %v1772_v63 = vld [vmem:[%s4772_s3 + $0x40] sm:$0xff] }
 0x225   : > { %v3299_v27 = vpop.eup %3298  ;;  %v2190_v5 = vrot.slane %v2189_v8, 2  ;;  %v2131_v20 = vadd.f32 %v2130_v59, %v2129_v32 }
 0x226   : > { %v2002_v28 = vrot.slane %v1722_v57, 4  ;;  %v3301_v24 = vpop.eup %3300  ;;  %v1762_v18 = vmul.f32 %v3299_v27, %v4612_v7  ;;  %v2066_v7 = vrot.slane %v2065_v19, 1  ;;  %v2072_v46 = vrot.slane %v2071_v34, 1  ;;  %v1773_v27 = vld [vmem:[%s4772_s3 + $0x48] sm:$0xff] }
 0x227   : > { %v3303_v10 = vpop.eup %3302  ;;  %v1723_v31 = vmul.f32 %v3301_v24, %v4619_v43  ;;  %v2126_v43 = vrot.slane %v2125_v2, 1  ;;  %v2132_v62 = vrot.slane %v2131_v20, 1  ;;  %v2187_v1 = vadd.f32 %v2186_v36, %v2185_v26  ;;  %v2465_v26 = vld [vmem:[%s4772_s3 + $0x10] sm:$0xff] (!%p2796_p10) }
 0x228   : > { %v2003_v56 = vadd.f32 %v2002_v28, %v1722_v57  ;;  %v2242_v60 = vrot.slane %v1762_v18, 4  ;;  %v1763_v39 = vmul.f32 %v3303_v10, %v4623_v44  ;;  %v2191_v44 = vadd.f32 %v2190_v5, %v2189_v8  ;;  %v2466_v5 = vld [vmem:[%s4772_s3 + $0x18] sm:$0xff] (!%p2796_p10)  ;;  %v2469_v36 = vld [vmem:[%s4772_s3 + $0x30] sm:$0xff] (!%p2796_p10) }
 0x229   : > { %v2008_v12 = vrot.slane %v1723_v31, 4  ;;  %v2067_v0 = vadd.f32 %v2066_v7, %v2065_v19  ;;  %v2127_v54 = vadd.f32 %v2126_v43, %v2125_v2  ;;  %v2073_v50 = vadd.f32 %v2072_v46, %v2071_v34  ;;  %v4933_v7 = vld [vmem:[#allocation5_spill] sm:$0xff] (!%p2796_p10) }
 0x22a   : > { %v2004_v35 = vrot.slane %v2003_v56, 2  ;;  %v2243_v3 = vadd.f32 %v2242_v60, %v1762_v18  ;;  %v2248_v33 = vrot.slane %v1763_v39, 4  ;;  %v2192_v52 = vrot.slane %v2191_v44, 1  ;;  %v2446_v18 = vld [vmem:[%s4771_s2 + $0x8] sm:$0x3] (!%p2796_p10) }
 0x22b   : > { %v2009_v4 = vadd.f32 %v2008_v12, %v1723_v31  ;;  %v2133_v41 = vadd.f32 %v2132_v62, %v2131_v20  ;;  %v2797_v8 = vmul.f32 (!%p2796_p10), -1.442695, %v2445_v45  ;;  %v2798_v10 = vmul.f32 (!%p2796_p10), -1.442695, %v2446_v18  ;;  %v2464_v12 = vld [vmem:[%s4772_s3 + $0x8] sm:$0xff] (!%p2796_p10) }
 0x22c   : > { %v2005_v42 = vadd.f32 %v2004_v35, %v2003_v56  ;;  %v2244_v55 = vrot.slane %v2243_v3, 2  ;;  %v2249_v37 = vadd.f32 %v2248_v33, %v1763_v39  ;;  %v2193_v57 = vadd.f32 %v2192_v52, %v2191_v44  ;;  %v2463_v35 = vld [vmem:[%s4772_s3] sm:$0xff] (!%p2796_p10)  ;;  %v2470_v44 = vld [vmem:[%s4772_s3 + $0x38] sm:$0xff] (!%p2796_p10) }
 0x22d   : > { %v2010_v40 = vrot.slane %v2009_v4, 2  ;;  %3304 = vpow2.f32 (!%p2796_p10), %v2797_v8 }
 0x22e   : > { %v2006_v22 = vrot.slane %v2005_v42, 1  ;;  %v2245_v16 = vadd.f32 %v2244_v55, %v2243_v3  ;;  %v2250_v30 = vrot.slane %v2249_v37, 2  ;;  %3306 = vpow2.f32 (!%p2796_p10), %v2798_v10  ;;  %v2467_v3 = vld [vmem:[%s4772_s3 + $0x20] sm:$0xff] (!%p2796_p10) }
 0x22f   : > { %v2011_v17 = vadd.f32 %v2010_v40, %v2009_v4  ;;  %v4934_v55 = vld [vmem:[#allocation3_spill] sm:$0xff] (!%p2796_p10)  ;;  %v2468_v40 = vld [vmem:[%s4772_s3 + $0x28] sm:$0xff] (!%p2796_p10) }
 0x230   : > { %v2007_v15 = vadd.f32 %v2006_v22, %v2005_v42  ;;  %v2246_v47 = vrot.slane %v2245_v16, 1  ;;  %v2251_v25 = vadd.f32 %v2250_v30, %v2249_v37  ;;  %v4932_v42 = vld [vmem:[#allocation4_spill] sm:$0xff] (!%p2796_p10)  ;;  %v4935_v37 = vsub.s32 (!%p2796_p10), 2, %v4934_v55 }
 0x231   : > { %v2012_v48 = vrot.slane %v2011_v17, 1  ;;  %v4936_v20 = vsub.s32 (!%p2796_p10), 3, %v4934_v55 }
 0x232   : > { %v2399_v53 = vsel %vm2338_vm2, %v2007_v15, %v2398_v6  ;;  %v2247_v9 = vadd.f32 %v2246_v47, %v2245_v16  ;;  %v2252_v61 = vrot.slane %v2251_v25, 1  ;;  %v4937_v16 = vsub.s32 (!%p2796_p10), 4, %v4934_v55 }
 0x233   : > { %v2400_v23 = vsel %vm2340_vm3, %v2067_v0, %v2399_v53  ;;  %v2013_v38 = vadd.f32 %v2012_v48, %v2011_v17  ;;  %v4938_v15 = vsub.s32 (!%p2796_p10), 5, %v4934_v55  ;;  %v4939_v0 = vsub.s32 (!%p2796_p10), 6, %v4934_v55 }
 0x234   : > { %v2401_v51 = vsel %vm2342_vm4, %v2127_v54, %v2400_v23  ;;  %v2253_v14 = vadd.f32 %v2252_v61, %v2251_v25  ;;  %v4940_v47 = vsub.s32 (!%p2796_p10), 7, %v4934_v55 }
 0x235   : > { %v2402_v58 = vsel %vm2344_vm5, %v2187_v1, %v2401_v51  ;;  %v2406_v49 = vsel %vm2338_vm2, %v2013_v38, %v4642_v11 }
 0x236   : > { %v2403_v6 = vsel %vm2346_vm6, %v2247_v9, %v2402_v58  ;;  %v2407_v13 = vsel %vm2340_vm3, %v2073_v50, %v2406_v49  ;;  %2444 = sbr.rel (%p2796_p10) target bundleno = 598 (0x256), region = 81 }
 0x237   : > { %v2429_v29 = vadd.f32 %v2403_v6, %v1772_v63  ;;  %v2408_v32 = vsel %vm2342_vm4, %v2133_v41, %v2407_v13  ;;  %v3305_v56 = vpop.eup (!%p2796_p10), %3304 }
 0x238   : > { %v2409_v28 = vsel %vm2344_vm5, %v2193_v57, %v2408_v32  ;;  %v2453_v31 = vadd.f32 (!%p2796_p10), 1.0, %v3305_v56  ;;  %v3307_v19 = vpop.eup (!%p2796_p10), %3306 }
 0x239   : > { %2439 = vst [vmem:[%s4772_s3 + $0x40] sm:$0xff] %v2429_v29  ;;  %v2410_v24 = vsel %vm2346_vm6, %v2253_v14, %v2409_v28  ;;  %v2454_v21 = vadd.f32 (!%p2796_p10), 1.0, %v3307_v19 }
 0x23a   : > { %v2430_v11 = vadd.f32 %v2410_v24, %v1773_v27  ;;  %3308 = vrcp.f32 (!%p2796_p10), %v2453_v31 }
 0x23b   : > { %3310 = vrcp.f32 (!%p2796_p10), %v2454_v21 }
 0x23c   : > { %2440 = vst [vmem:[%s4772_s3 + $0x48] sm:$0xff] %v2430_v11 }
 0x240   : > { %v2471_v57 = vld [vmem:[%s4772_s3 + $0x40] sm:$0xff] }
 0x243   : > { %v2472_v29 = vld [vmem:[%s4772_s3 + $0x48] sm:$0xff] }
 0x244   : > { %v3309_v60 = vpop.eup %3308 }
 0x245   : > { %v2459_v39 = vmul.f32 %v3309_v60, %v2445_v45  ;;  %v3311_v2 = vpop.eup %3310 }
 0x246   : > { %v2460_v33 = vmul.f32 %v3311_v2, %v2446_v18 }
 0x247   : > { %v2461_v59 = vmul.f32 0.0, %v2459_v39 }
 0x248   : > { %v2462_v49 = vmul.f32 0.0, %v2460_v33 }
 0x249   : > { %v2478_v4 = vrot.slane %v2461_v59, %v4932_v42  ;;  %v2482_v34 = vrot.slane %v2461_v59, %v4933_v7  ;;  %v2486_v43 = vrot.slane %v2461_v59, %v4935_v37  ;;  %v2490_v22 = vrot.slane %v2461_v59, %v4936_v20 }
 0x24a   : > { %v2494_v30 = vrot.slane %v2461_v59, %v4937_v16  ;;  %v2498_v17 = vrot.slane %v2461_v59, %v4938_v15  ;;  %v2502_v46 = vrot.slane %v2461_v59, %v4939_v0  ;;  %v2506_v25 = vrot.slane %v2461_v59, %v4940_v47 }
 0x24b   : > { %v2525_v54 = vsub.f32 %v2463_v35, %v2478_v4  ;;  %v2526_v62 = vsub.f32 %v2464_v12, %v2482_v34  ;;  %v2527_v53 = vsub.f32 %v2465_v26, %v2486_v43  ;;  %v2528_v48 = vsub.f32 %v2466_v5, %v2490_v22 }
 0x24c   : > { %v2529_v1 = vsub.f32 %v2467_v3, %v2494_v30  ;;  %v2530_v52 = vsub.f32 %v2468_v40, %v2498_v17  ;;  %v2531_v23 = vsub.f32 %v2469_v36, %v2502_v46  ;;  %v2532_v63 = vsub.f32 %v2470_v44, %v2506_v25 }
 0x24d   : > { %v2535_v9 = vmul.f32 0.0625, %v2525_v54  ;;  %v2536_v51 = vmul.f32 0.0625, %v2526_v62  ;;  %v2537_v38 = vmul.f32 0.0625, %v2527_v53  ;;  %v2538_v61 = vmul.f32 0.0625, %v2528_v48 }
 0x24e   : > { %v2539_v50 = vmul.f32 0.0625, %v2529_v1  ;;  %v2540_v58 = vmul.f32 0.0625, %v2530_v52  ;;  %v2541_v41 = vmul.f32 0.0625, %v2531_v23  ;;  %v2542_v6 = vmul.f32 0.0625, %v2532_v63 }
 0x24f   : > { %2545 = vst [vmem:[%s4772_s3] sm:$0xff] %v2535_v9  ;;  %2546 = vst [vmem:[%s4772_s3 + $0x8] sm:$0xff] %v2536_v51  ;;  %v2510_v13 = vrot.slane %v2462_v49, %v4932_v42  ;;  %v2514_v27 = vrot.slane %v2462_v49, %v4933_v7 }
 0x250   : > { %2547 = vst [vmem:[%s4772_s3 + $0x10] sm:$0xff] %v2537_v38  ;;  %2548 = vst [vmem:[%s4772_s3 + $0x18] sm:$0xff] %v2538_v61 }
 0x251   : > { %2549 = vst [vmem:[%s4772_s3 + $0x20] sm:$0xff] %v2539_v50  ;;  %2550 = vst [vmem:[%s4772_s3 + $0x28] sm:$0xff] %v2540_v58  ;;  %v2533_v14 = vsub.f32 %v2471_v57, %v2510_v13  ;;  %v2534_v32 = vsub.f32 %v2472_v29, %v2514_v27 }
 0x252   : > { %2551 = vst [vmem:[%s4772_s3 + $0x30] sm:$0xff] %v2541_v41  ;;  %2552 = vst [vmem:[%s4772_s3 + $0x38] sm:$0xff] %v2542_v6 }
 0x253   : > { %v2543_v28 = vmul.f32 0.0625, %v2533_v14  ;;  %v2544_v24 = vmul.f32 0.0625, %v2534_v32 }
 0x255   : > { %2553 = vst [vmem:[%s4772_s3 + $0x40] sm:$0xff] %v2543_v28  ;;  %2554 = vst [vmem:[%s4772_s3 + $0x48] sm:$0xff] %v2544_v24 }
 0x256 PF: > { %s13_s16 = sadd.s32 1, %s3350_s16   ;;  %s4941_s12 = smov %s3338_s13 }
 0x257   : > { %p10_p11 = scmp.ge.s32.totalorder %s13_s16, 4   ;;  %s4942_s13 = smov %s3409_s20 }
 0x258   : > { %s4943_s14 = smov %s3346_s15  ;;  %s4944_s15 = smov %s4946_s17 }
 0x259   :  { %12 = sbr.rel (!%p10_p11) target bundleno = 3 (0x3), region = 116 }

</bundles_post_ra>
